<compile_context>
chip_gen: v7x
topology: tpu7x:2x2x1
jax: 0.10.0
libtpu: 0.0.40
codegen_flags: <defaults>
</compile_context>

<pallas_src>
import jax
import jax.numpy as jnp
from jax import lax
from jax.experimental import pallas as pl
from jax.experimental.pallas import tpu as pltpu


def _cdiv(a, b):
    return -(-a // b)


def _round_up(a, b):
    return _cdiv(a, b) * b


@jax.jit
def segnet_forward(x_nchw, params):
    """x_nchw: (1, Cin, H, W) float32 (PyTorch NCHW). Returns (H, W) int32."""
    w1, b1, w2, b2 = params                       # (3,3,Cin,Ch), (Ch,), (Ch,C), (C,)
    _, cin, h, w = x_nchw.shape
    ch = w1.shape[-1]
    n_cls = w2.shape[-1]

    # ---- flat, padded, pixel-major geometry --------------------------------------
    wp = w + 2                                    # horizontally padded width
    mp = (h + 2) * wp                             # all padded pixel positions, flattened
    halo = wp + 1                                 # one padded row + one column of halo
    cin_p = _round_up(cin, 8)                     # sublane-aligned channel count

    # pixel tile: >= ~8 image rows, >= 8192 px when the image allows, lane aligned,
    # and >= 2 tiles when possible so "parallel" splits across v7x's two TensorCores.
    tm = min(max(8192, 8 * halo), _cdiv(mp, 2))
    tm = max(128, _round_up(tm, 128))
    g = _cdiv(mp, tm)
    ts = tm + 2 * halo                            # slab width (tile + halo both sides)

    # ---- one cheap prep pass: cast -> zero-pad -> flatten -> halo'd slabs ---------
    xb = x_nchw[0].astype(jnp.bfloat16)                                    # (Cin,H,W)
    xp = jnp.pad(xb, ((0, cin_p - cin), (1, 1), (1, 1)))                   # (Cinp,H+2,Wp)
    pf = xp.reshape(cin_p, mp)                                             # row-major flat
    pf = jnp.pad(pf, ((0, 0), (halo, halo + g * tm - mp)))                 # guard band
    sl_idx = (jnp.arange(g, dtype=jnp.int32)[:, None] * tm
              + jnp.arange(ts, dtype=jnp.int32)[None, :])                  # (g, TS)
    slabs = jnp.moveaxis(jnp.take(pf, sl_idx, axis=1), 1, 0)               # (g,Cinp,TS) bf16

    # ---- weights: tap-major (Ch, 9*Cinp) bf16, biases as (rows, 1) f32 ------------
    w1_t = jnp.transpose(w1, (3, 0, 1, 2))                                 # (Ch,3,3,Cin)
    w1_t = jnp.pad(w1_t, ((0, 0), (0, 0), (0, 0), (0, cin_p - cin)))       # (Ch,3,3,Cinp)
    w1_mat = w1_t.reshape(ch, 9 * cin_p).astype(jnp.bfloat16)
    b1_c = b1.reshape(ch, 1).astype(jnp.float32)
    w2_t = w2.T.astype(jnp.float32)                                        # (C, Ch)
    b2_c = b2.reshape(n_cls, 1).astype(jnp.float32)

    # flat-index starts of the 9 conv taps inside a slab (static Python ints):
    # tap (kh, kw) for flat pixel p lives at slab column (kh*Wp + kw) + local_pixel.
    tap_starts = [kh * wp + kw for kh in range(3) for kw in range(3)]

    def kernel(x_ref, w1_ref, b1_ref, w2_ref, b2_ref, o_ref, patch_ref):
        # x_ref    : (1, Cinp, TS)  bf16   halo'd flat image slab (lane-dense, contiguous)
        # w1_ref   : (Ch, 9*Cinp)   bf16   resident
        # b1_ref   : (Ch, 1)        f32    resident
        # w2_ref   : (C, Ch)        f32    resident
        # b2_ref   : (C, 1)         f32    resident
        # o_ref    : (1, 1, TM)     int32
        # patch_ref: (9*Cinp, TM)   bf16   VMEM scratch (in-kernel im2col)

        # ---- in-kernel im2col: 9 static lane-offset slices of the slab ------------
        for t, s in enumerate(tap_starts):
            patch_ref[t * cin_p:(t + 1) * cin_p, :] = x_ref[0, :, s:s + tm]

        # ---- conv3x3 as ONE matmul (bf16 operands, f32 accumulation on MXU) -------
        hcol = jnp.dot(w1_ref[...], patch_ref[...],
                       preferred_element_type=jnp.float32)                 # (Ch, TM)
        hcol = jnp.maximum(hcol + b1_ref[...], 0.0)                        # bias + ReLU

        # ---- 1x1 conv to class logits (f32; no extra bf16 cast pass) --------------
        logits = jnp.dot(w2_ref[...], hcol,
                         preferred_element_type=jnp.float32) + b2_ref[...]  # (C, TM)

        # ---- argmax over classes (first maximal index, like torch.argmax) ---------
        # TODO(synk): NaN logits would map to index n_cls (-> 255); torch differs on NaN.
        mx = jnp.max(logits, axis=0, keepdims=True)                        # (1, TM)
        cls = lax.broadcasted_iota(jnp.int32, logits.shape, 0)             # (C, TM)
        idx_ = jnp.min(jnp.where(logits == mx, cls, n_cls),
                       axis=0, keepdims=True)                              # (1, TM)

        # ---- .mul(100).clamp(0, 255) ----------------------------------------------
        o_ref[...] = jnp.clip(idx_ * 100, 0, 255).astype(jnp.int32)[None]

    # vmem limit from the actual buffers (double-buffered I/O) + compiler headroom
    slab_b = cin_p * ts * 2
    patch_b = 9 * cin_p * tm * 2
    out_b = tm * 4
    wgt_b = ch * 9 * cin_p * 2 + ch * 4 + n_cls * ch * 4 + n_cls * 4
    tmp_b = 12 * ch * tm * 4                      # headroom for elementwise temporaries
    vmem_limit = int(min(48 * 1024 * 1024,
                         max(16 * 1024 * 1024,
                             2 * slab_b + 2 * out_b + patch_b + wgt_b + tmp_b)))

    out = pl.pallas_call(
        kernel,
        out_shape=jax.ShapeDtypeStruct((g, 1, tm), jnp.int32),
        grid=(g,),
        in_specs=[
            pl.BlockSpec((1, cin_p, ts), lambda i: (i, 0, 0)),   # contiguous slab per tile
            pl.BlockSpec((ch, 9 * cin_p), lambda i: (0, 0)),     # weights / biases resident
            pl.BlockSpec((ch, 1), lambda i: (0, 0)),
            pl.BlockSpec((n_cls, ch), lambda i: (0, 0)),
            pl.BlockSpec((n_cls, 1), lambda i: (0, 0)),
        ],
        out_specs=pl.BlockSpec((1, 1, tm), lambda i: (i, 0, 0)),
        scratch_shapes=[pltpu.VMEM((9 * cin_p, tm), jnp.bfloat16)],
        compiler_params=pltpu.CompilerParams(
            dimension_semantics=("parallel",),                   # megacore split on v7x
            vmem_limit_bytes=vmem_limit,
        ),
    )(slabs, w1_mat, b1_c, w2_t, b2_c)

    # drop the tile tail and the padded border rows/columns
    full = out.reshape(g * tm)[:mp].reshape(h + 2, wp)
    return full[1:h + 1, 1:w + 1]


def _reference(x_nchw, params):
    """Independent pure-JAX reference of the same simplified forward (bf16 conv
    operands / f32 accumulation, f32 classifier — same precision as the kernel)."""
    w1, b1, w2, b2 = params
    y = lax.conv_general_dilated(
        x_nchw.astype(jnp.bfloat16), w1.astype(jnp.bfloat16),
        window_strides=(1, 1), padding=((1, 1), (1, 1)),
        dimension_numbers=("NCHW", "HWIO", "NCHW"),
        preferred_element_type=jnp.float32)
    y = jnp.maximum(y + b1[None, :, None, None], 0.0)
    logits = jnp.einsum("nchw,cd->ndhw", y, w2,
                        preferred_element_type=jnp.float32) + b2[None, :, None, None]
    idx = jnp.argmax(logits[0], axis=0)                          # squeeze(0).argmax(0)
    return jnp.clip(idx * 100, 0, 255).astype(jnp.int32)


if __name__ == "__main__":
    Cin, Ch, C, H, W = 3, 32, 8, 32, 128                         # small; 2-step parallel grid

    key = jax.random.PRNGKey(0)
    kx, k1, k2, k3, k4 = jax.random.split(key, 5)
    x = jax.random.normal(kx, (1, Cin, H, W), jnp.float32)
    w1 = jax.random.normal(k1, (3, 3, Cin, Ch), jnp.float32) * 0.1
    b1 = jax.random.normal(k2, (Ch,), jnp.float32) * 0.1
    w2 = jax.random.normal(k3, (Ch, C), jnp.float32) * 0.1
    b2 = jax.random.normal(k4, (C,), jnp.float32) * 0.1
    params = (w1, b1, w2, b2)

    out = jax.block_until_ready(segnet_forward(x, params))
    assert out.shape == (H, W) and out.dtype == jnp.int32

    ref = jax.block_until_ready(_reference(x, params))
    agree = float(jnp.mean((out == ref).astype(jnp.float32)))
    assert agree >= 0.99, f"argmax agreement with reference too low: {agree}"

    print("KERNEL_OK")
</pallas_src>

<mosaic_0001>
module attributes {stable_mosaic.version = 11 : i64} {
  func.func @kernel(%arg0: i32, %arg1: memref<1x8x2566xbf16, #tpu.memory_space<vmem>>, %arg2: memref<32x72xbf16, #tpu.memory_space<vmem>>, %arg3: memref<32x1xf32, #tpu.memory_space<vmem>>, %arg4: memref<8x32xf32, #tpu.memory_space<vmem>>, %arg5: memref<8x1xf32, #tpu.memory_space<vmem>>, %arg6: memref<1x1x2304xi32, #tpu.memory_space<vmem>>, %arg7: memref<72x2304xbf16, #tpu.memory_space<vmem>>) attributes {dimension_semantics = [#tpu.dimension_semantics<parallel>], iteration_bounds = array<i64: 2>, scalar_prefetch = 0 : i64, scratch_operands = 1 : i64, tpu.core_type = #tpu.core_type<tc>, window_params = [{transform_indices = @transform_0, window_bounds = array<i64: 1, 8, 2566>}, {pipeline_mode = #tpu.pipeline_mode<synchronous>, transform_indices = @transform_1, window_bounds = array<i64: 32, 72>}, {pipeline_mode = #tpu.pipeline_mode<synchronous>, transform_indices = @transform_2, window_bounds = array<i64: 32, 1>}, {pipeline_mode = #tpu.pipeline_mode<synchronous>, transform_indices = @transform_3, window_bounds = array<i64: 8, 32>}, {pipeline_mode = #tpu.pipeline_mode<synchronous>, transform_indices = @transform_4, window_bounds = array<i64: 8, 1>}, {transform_indices = @transform_5, window_bounds = array<i64: 1, 1, 2304>}]} {
    %c0 = arith.constant 0 : index
    %c0_0 = arith.constant 0 : index
    %c0_1 = arith.constant 0 : index
    %0 = vector.load %arg1[%c0, %c0_0, %c0_1] : memref<1x8x2566xbf16, #tpu.memory_space<vmem>>, vector<1x8x2304xbf16>
    %1 = vector.shape_cast %0 : vector<1x8x2304xbf16> to vector<8x2304xbf16>
    %c0_2 = arith.constant 0 : index
    %c0_3 = arith.constant 0 : index
    %2 = vector.load %arg7[%c0_2, %c0_3] : memref<72x2304xbf16, #tpu.memory_space<vmem>>, vector<8x2304xbf16>
    tpu.vector_store %arg7[%c0_2, %c0_3], %1 {strides = array<i32>} : memref<72x2304xbf16, #tpu.memory_space<vmem>>, vector<8x2304xbf16>,
    %c0_4 = arith.constant 0 : index
    %c0_5 = arith.constant 0 : index
    %c1 = arith.constant 1 : index
    %3 = vector.load %arg1[%c0_4, %c0_5, %c1] : memref<1x8x2566xbf16, #tpu.memory_space<vmem>>, vector<1x8x2304xbf16>
    %4 = vector.shape_cast %3 : vector<1x8x2304xbf16> to vector<8x2304xbf16>
    %c8 = arith.constant 8 : index
    %c0_6 = arith.constant 0 : index
    %5 = vector.load %arg7[%c8, %c0_6] : memref<72x2304xbf16, #tpu.memory_space<vmem>>, vector<8x2304xbf16>
    tpu.vector_store %arg7[%c8, %c0_6], %4 {strides = array<i32>} : memref<72x2304xbf16, #tpu.memory_space<vmem>>, vector<8x2304xbf16>,
    %c0_7 = arith.constant 0 : index
    %c0_8 = arith.constant 0 : index
    %c2 = arith.constant 2 : index
    %6 = vector.load %arg1[%c0_7, %c0_8, %c2] : memref<1x8x2566xbf16, #tpu.memory_space<vmem>>, vector<1x8x2304xbf16>
    %7 = vector.shape_cast %6 : vector<1x8x2304xbf16> to vector<8x2304xbf16>
    %c16 = arith.constant 16 : index
    %c0_9 = arith.constant 0 : index
    %8 = vector.load %arg7[%c16, %c0_9] : memref<72x2304xbf16, #tpu.memory_space<vmem>>, vector<8x2304xbf16>
    tpu.vector_store %arg7[%c16, %c0_9], %7 {strides = array<i32>} : memref<72x2304xbf16, #tpu.memory_space<vmem>>, vector<8x2304xbf16>,
    %c0_10 = arith.constant 0 : index
    %c0_11 = arith.constant 0 : index
    %c130 = arith.constant 130 : index
    %9 = vector.load %arg1[%c0_10, %c0_11, %c130] : memref<1x8x2566xbf16, #tpu.memory_space<vmem>>, vector<1x8x2304xbf16>
    %10 = vector.shape_cast %9 : vector<1x8x2304xbf16> to vector<8x2304xbf16>
    %c24 = arith.constant 24 : index
    %c0_12 = arith.constant 0 : index
    %11 = vector.load %arg7[%c24, %c0_12] : memref<72x2304xbf16, #tpu.memory_space<vmem>>, vector<8x2304xbf16>
    tpu.vector_store %arg7[%c24, %c0_12], %10 {strides = array<i32>} : memref<72x2304xbf16, #tpu.memory_space<vmem>>, vector<8x2304xbf16>,
    %c0_13 = arith.constant 0 : index
    %c0_14 = arith.constant 0 : index
    %c131 = arith.constant 131 : index
    %12 = vector.load %arg1[%c0_13, %c0_14, %c131] : memref<1x8x2566xbf16, #tpu.memory_space<vmem>>, vector<1x8x2304xbf16>
    %13 = vector.shape_cast %12 : vector<1x8x2304xbf16> to vector<8x2304xbf16>
    %c32 = arith.constant 32 : index
    %c0_15 = arith.constant 0 : index
    %14 = vector.load %arg7[%c32, %c0_15] : memref<72x2304xbf16, #tpu.memory_space<vmem>>, vector<8x2304xbf16>
    tpu.vector_store %arg7[%c32, %c0_15], %13 {strides = array<i32>} : memref<72x2304xbf16, #tpu.memory_space<vmem>>, vector<8x2304xbf16>,
    %c0_16 = arith.constant 0 : index
    %c0_17 = arith.constant 0 : index
    %c132 = arith.constant 132 : index
    %15 = vector.load %arg1[%c0_16, %c0_17, %c132] : memref<1x8x2566xbf16, #tpu.memory_space<vmem>>, vector<1x8x2304xbf16>
    %16 = vector.shape_cast %15 : vector<1x8x2304xbf16> to vector<8x2304xbf16>
    %c40 = arith.constant 40 : index
    %c0_18 = arith.constant 0 : index
    %17 = vector.load %arg7[%c40, %c0_18] : memref<72x2304xbf16, #tpu.memory_space<vmem>>, vector<8x2304xbf16>
    tpu.vector_store %arg7[%c40, %c0_18], %16 {strides = array<i32>} : memref<72x2304xbf16, #tpu.memory_space<vmem>>, vector<8x2304xbf16>,
    %c0_19 = arith.constant 0 : index
    %c0_20 = arith.constant 0 : index
    %c260 = arith.constant 260 : index
    %18 = vector.load %arg1[%c0_19, %c0_20, %c260] : memref<1x8x2566xbf16, #tpu.memory_space<vmem>>, vector<1x8x2304xbf16>
    %19 = vector.shape_cast %18 : vector<1x8x2304xbf16> to vector<8x2304xbf16>
    %c48 = arith.constant 48 : index
    %c0_21 = arith.constant 0 : index
    %20 = vector.load %arg7[%c48, %c0_21] : memref<72x2304xbf16, #tpu.memory_space<vmem>>, vector<8x2304xbf16>
    tpu.vector_store %arg7[%c48, %c0_21], %19 {strides = array<i32>} : memref<72x2304xbf16, #tpu.memory_space<vmem>>, vector<8x2304xbf16>,
    %c0_22 = arith.constant 0 : index
    %c0_23 = arith.constant 0 : index
    %c261 = arith.constant 261 : index
    %21 = vector.load %arg1[%c0_22, %c0_23, %c261] : memref<1x8x2566xbf16, #tpu.memory_space<vmem>>, vector<1x8x2304xbf16>
    %22 = vector.shape_cast %21 : vector<1x8x2304xbf16> to vector<8x2304xbf16>
    %c56 = arith.constant 56 : index
    %c0_24 = arith.constant 0 : index
    %23 = vector.load %arg7[%c56, %c0_24] : memref<72x2304xbf16, #tpu.memory_space<vmem>>, vector<8x2304xbf16>
    tpu.vector_store %arg7[%c56, %c0_24], %22 {strides = array<i32>} : memref<72x2304xbf16, #tpu.memory_space<vmem>>, vector<8x2304xbf16>,
    %c0_25 = arith.constant 0 : index
    %c0_26 = arith.constant 0 : index
    %c262 = arith.constant 262 : index
    %24 = vector.load %arg1[%c0_25, %c0_26, %c262] : memref<1x8x2566xbf16, #tpu.memory_space<vmem>>, vector<1x8x2304xbf16>
    %25 = vector.shape_cast %24 : vector<1x8x2304xbf16> to vector<8x2304xbf16>
    %c64 = arith.constant 64 : index
    %c0_27 = arith.constant 0 : index
    %26 = vector.load %arg7[%c64, %c0_27] : memref<72x2304xbf16, #tpu.memory_space<vmem>>, vector<8x2304xbf16>
    tpu.vector_store %arg7[%c64, %c0_27], %25 {strides = array<i32>} : memref<72x2304xbf16, #tpu.memory_space<vmem>>, vector<8x2304xbf16>,
    %c0_28 = arith.constant 0 : index
    %c0_29 = arith.constant 0 : index
    %27 = vector.load %arg2[%c0_28, %c0_29] : memref<32x72xbf16, #tpu.memory_space<vmem>>, vector<32x72xbf16>
    %c0_30 = arith.constant 0 : index
    %c0_31 = arith.constant 0 : index
    %28 = vector.load %arg7[%c0_30, %c0_31] : memref<72x2304xbf16, #tpu.memory_space<vmem>>, vector<72x2304xbf16>
    %cst = arith.constant dense<0.000000e+00> : vector<32x2304xf32>
    %29 = tpu.matmul %27, %28, %cst {dimension_numbers = #tpu.dot_dimension_numbers<[1], [0], [0], [1], [0, 0, 1, 1], [], []>} : vector<32x72xbf16>, vector<72x2304xbf16>, vector<32x2304xf32> -> vector<32x2304xf32>
    %c0_32 = arith.constant 0 : index
    %c0_33 = arith.constant 0 : index
    %30 = vector.load %arg3[%c0_32, %c0_33] : memref<32x1xf32, #tpu.memory_space<vmem>>, vector<32x1xf32>
    %31 = vector.broadcast %30 : vector<32x1xf32> to vector<32x2304xf32>
    %32 = arith.addf %29, %31 : vector<32x2304xf32>
    %cst_34 = arith.constant 0.000000e+00 : f32
    %33 = vector.broadcast %cst_34 : f32 to vector<32x2304xf32>
    %34 = arith.maximumf %32, %33 : vector<32x2304xf32>
    %c0_35 = arith.constant 0 : index
    %c0_36 = arith.constant 0 : index
    %35 = vector.load %arg4[%c0_35, %c0_36] : memref<8x32xf32, #tpu.memory_space<vmem>>, vector<8x32xf32>
    %cst_37 = arith.constant dense<0.000000e+00> : vector<8x2304xf32>
    %36 = tpu.matmul %35, %34, %cst_37 {dimension_numbers = #tpu.dot_dimension_numbers<[1], [0], [0], [1], [0, 0, 1, 1], [], []>} : vector<8x32xf32>, vector<32x2304xf32>, vector<8x2304xf32> -> vector<8x2304xf32>
    %c0_38 = arith.constant 0 : index
    %c0_39 = arith.constant 0 : index
    %37 = vector.load %arg5[%c0_38, %c0_39] : memref<8x1xf32, #tpu.memory_space<vmem>>, vector<8x1xf32>
    %38 = vector.broadcast %37 : vector<8x1xf32> to vector<8x2304xf32>
    %39 = arith.addf %36, %38 : vector<8x2304xf32>
    %cst_40 = arith.constant dense<0xFF800000> : vector<2304xf32>
    %40 = vector.multi_reduction <maximumf>, %39, %cst_40 [0] : vector<8x2304xf32> to vector<2304xf32>
    %41 = vector.shape_cast %40 : vector<2304xf32> to vector<1x2304xf32>
    %42 = tpu.iota {dimensions = array<i32: 0>} : vector<8x2304xi32>
    %43 = vector.broadcast %41 : vector<1x2304xf32> to vector<8x2304xf32>
    %44 = arith.cmpf oeq, %39, %43 : vector<8x2304xf32>
    %c8_i32 = arith.constant 8 : i32
    %45 = vector.broadcast %c8_i32 : i32 to vector<8x2304xi32>
    %46 = arith.select %44, %42, %45 : vector<8x2304xi1>, vector<8x2304xi32>
    %cst_41 = arith.constant dense<2147483647> : vector<2304xi32>
    %47 = vector.multi_reduction <minsi>, %46, %cst_41 [0] : vector<8x2304xi32> to vector<2304xi32>
    %48 = vector.shape_cast %47 : vector<2304xi32> to vector<1x2304xi32>
    %c100_i32 = arith.constant 100 : i32
    %49 = vector.broadcast %c100_i32 : i32 to vector<1x2304xi32>
    %50 = arith.muli %48, %49 : vector<1x2304xi32>
    %c0_i32 = arith.constant 0 : i32
    %c255_i32 = arith.constant 255 : i32
    %51 = vector.broadcast %c0_i32 : i32 to vector<1x2304xi32>
    %52 = arith.maxsi %51, %50 : vector<1x2304xi32>
    %53 = vector.broadcast %c255_i32 : i32 to vector<1x2304xi32>
    %54 = arith.minsi %53, %52 : vector<1x2304xi32>
    %55 = vector.shape_cast %54 : vector<1x2304xi32> to vector<1x1x2304xi32>
    %c0_42 = arith.constant 0 : index
    %c0_43 = arith.constant 0 : index
    %c0_44 = arith.constant 0 : index
    %56 = vector.load %arg6[%c0_42, %c0_43, %c0_44] : memref<1x1x2304xi32, #tpu.memory_space<vmem>>, vector<1x1x2304xi32>
    tpu.vector_store %arg6[%c0_42, %c0_43, %c0_44], %55 {strides = array<i32>} : memref<1x1x2304xi32, #tpu.memory_space<vmem>>, vector<1x1x2304xi32>,
    return
  }
  func.func @transform_0(%arg0: i32) -> (i32, i32, i32) {
    %c0_i32 = arith.constant 0 : i32
    %c0_i32_0 = arith.constant 0 : i32
    %c0_i32_1 = arith.constant 0 : i32
    return %arg0, %c0_i32, %c0_i32_0 : i32, i32, i32
  }
  func.func @transform_1(%arg0: i32) -> (i32, i32) {
    %c0_i32 = arith.constant 0 : i32
    %c0_i32_0 = arith.constant 0 : i32
    %c0_i32_1 = arith.constant 0 : i32
    return %c0_i32, %c0_i32_0 : i32, i32
  }
  func.func @transform_2(%arg0: i32) -> (i32, i32) {
    %c0_i32 = arith.constant 0 : i32
    %c0_i32_0 = arith.constant 0 : i32
    %c0_i32_1 = arith.constant 0 : i32
    return %c0_i32, %c0_i32_0 : i32, i32
  }
  func.func @transform_3(%arg0: i32) -> (i32, i32) {
    %c0_i32 = arith.constant 0 : i32
    %c0_i32_0 = arith.constant 0 : i32
    %c0_i32_1 = arith.constant 0 : i32
    return %c0_i32, %c0_i32_0 : i32, i32
  }
  func.func @transform_4(%arg0: i32) -> (i32, i32) {
    %c0_i32 = arith.constant 0 : i32
    %c0_i32_0 = arith.constant 0 : i32
    %c0_i32_1 = arith.constant 0 : i32
    return %c0_i32, %c0_i32_0 : i32, i32
  }
  func.func @transform_5(%arg0: i32) -> (i32, i32, i32) {
    %c0_i32 = arith.constant 0 : i32
    %c0_i32_0 = arith.constant 0 : i32
    %c0_i32_1 = arith.constant 0 : i32
    return %arg0, %c0_i32, %c0_i32_0 : i32, i32, i32
  }
}

</mosaic_0001>

<bundles_post_ra>
// kernel: segnet_forward.1
= control target key start
LH: loop header
LB: loop body
LE: loop exit
PB: predicated region body
PF: predicated region fallthrough
CT: control target
= control target key end

     0   :  { %s3571_s18 = smov 0   ;;  %s4505_s0 = inlined_call_operand.vmem [shape: bf16[2,8,2566], index: 0, kind: input, shape index: {}]   ;;  %s4506_s1 = inlined_call_operand.vmem [shape: bf16[32,72], index: 1, kind: input, shape index: {}]   ;;  %s4507_s2 = inlined_call_operand.vmem [shape: f32[32,1], index: 2, kind: input, shape index: {}]   ;;  %s4508_s3 = inlined_call_operand.vmem [shape: f32[8,32], index: 3, kind: input, shape index: {}]   ;;  %s4509_s4 = inlined_call_operand.vmem [shape: f32[8,1], index: 4, kind: input, shape index: {}]   ;;  %s4510_s5 = inlined_call_operand.vmem [shape: s32[2,1,2304], index: 5, kind: output, shape index: {}]  }
   0x1 LB: > { %s3293_s19 = sadd.s32 4294967295, %s3530_s18   ;;  %p3297_p0 = scmp.ge.s32.totalorder %s3530_s18, 1  ;;  %s3530_s18 = sphi %s3571_s18, %s15_s18  }
   0x2   : > { %p187_p1 = scmp.lt.s32.totalorder %s3530_s18, 3 }
   0x4   : > { %p188_p2 = pnand %p3297_p0, %p187_p1 }
   0x5   : > { %p214_p3 = scmp.lt.s32.totalorder (!%p188_p2), %s3293_s19, 1  ;;  %s3532_s24 = smov (!%p188_p2), 126   ;;  %v3538_v6 = vmov (!%p188_p2), 0   ;;  %vm292_vm0 = vcmask (!%p188_p2), 1043456   ;;  %vm294_vm1 = vcmask (!%p188_p2), 1039360   ;;  %vm381_vm2 = vcmask (!%p188_p2), 1031168  }
   0x6   : > { %191 = sbr.rel (%p188_p2) target bundleno = 792 (0x318), region = 40  ;;  %s3533_s25 = smov (!%p188_p2), 127   ;;  %1555 = vmatprep.mubr.bf16.mxu0 (!%p188_p2), %v3538_v6  ;;  %1608 = vmatprep.mubr.bf16.mxu1 (!%p188_p2), %v3538_v6  ;;  %vm554_vm3 = vcmask (!%p188_p2), 1022976   ;;  %vm641_vm4 = vcmask (!%p188_p2), 1014784   ;;  %vm814_vm5 = vcmask (!%p188_p2), 1006592   ;;  %vm901_vm6 = vcmask (!%p188_p2), 998400  }
   0x7   : > { %s3534_s26 = smov (!%p188_p2), 125   ;;  %s3535_s27 = smov (!%p188_p2), 124   ;;  %3521 = vset.pattern.permute.xlu1 (!%p188_p2), %v3538_v6  ;;  %3520 = vset.pattern.permute.xlu0 (!%p188_p2), %v3538_v6  ;;  %vm1461_vm7 = vcmask (!%p188_p2), 588800   ;;  %vm2079_vm8 = vcmask (!%p188_p2), 261120  }
   0x8   : > { %s3536_s28 = smov (!%p188_p2), 123   ;;  %s3537_s29 = smov (!%p188_p2), 122  }
   0xd   : > { %s4512_s19 = smov (!%p214_p3, %s3293_s19), 1 }
   0xe   : > { %s3501_s20 = smul.u32 84, %s4512_s19 }
  0x10   : > { %s3585_s23 = scalar_lea.vmem %s4505_s0, %s3501_s20 }
  0x11   : > { %v3588_v0 = vld [vmem:[%s3585_s23] sm:$0xff]  ;;  %v3595_v1 = vld [vmem:[%s3585_s23 + $0x8] sm:$0xff]  ;;  %v3610_v4 = vld [vmem:[%s3585_s23 + $0x10] sm:$0xff] }
  0x12   : > { %350 = vrot.lane.b32.xlu1 %v3588_v0, %s3532_s24  ;;  %262 = vrot.lane.b32.xlu0 %v3588_v0, %s3533_s25  ;;  %v418_v2 = vld [vmem:[%s3585_s23 + $0xc] sm:$0xff]  ;;  %v417_v3 = vld [vmem:[%s3585_s23 + $0x4] sm:$0xff] }
  0x13   : > { %v3625_v5 = vld [vmem:[%s3585_s23 + $0x18] sm:$0xff]  ;;  %v3652_v9 = vld [vmem:[%s3585_s23 + $0x20] sm:$0xff]  ;;  %v3663_v10 = vld [vmem:[%s3585_s23 + $0x28] sm:$0xff] }
  0x14   : > { %v419_v7 = vld [vmem:[%s3585_s23 + $0x14] sm:$0xff]  ;;  %v420_v8 = vld [vmem:[%s3585_s23 + $0x1c] sm:$0xff]  ;;  %v421_v11 = vld [vmem:[%s3585_s23 + $0x24] sm:$0xff] }
  0x15   : > { %v422_v12 = vld [vmem:[%s3585_s23 + $0x2c] sm:$0xff]  ;;  %v3697_v14 = vld [vmem:[%s3585_s23 + $0x38] sm:$0xff]  ;;  %v3720_v19 = vld [vmem:[%s3585_s23 + $0x40] sm:$0xff] }
  0x16   : > { %352 = vrot.lane.b32.xlu1 %v3595_v1, %s3532_s24  ;;  %264 = vrot.lane.b32.xlu0 %v3595_v1, %s3533_s25  ;;  %v3686_v13 = vld [vmem:[%s3585_s23 + $0x30] sm:$0xff]  ;;  %v424_v16 = vld [vmem:[%s3585_s23 + $0x3c] sm:$0xff] }
  0x17   : > { %v423_v15 = vld [vmem:[%s3585_s23 + $0x34] sm:$0xff]  ;;  %v251_v36 = vld [vmem:[%s3585_s23 + $0x48] sm:$0xf]  ;;  %v426_v52 = vld [vmem:[%s3585_s23 + $0x4c] sm:$0xf] }
  0x18   : > { %v425_v45 = vld [vmem:[%s3585_s23 + $0x44] sm:$0xff] }
  0x19   : > { %v339_v53 = vld [vmem:[%s3585_s23 + $0x48] sm:$0xf] }
  0x1a   : > { %439 = vrot.lane.b32.xlu1 %v418_v2, %s3532_s24  ;;  %437 = vrot.lane.b32.xlu0 %v417_v3, %s3532_s24 }
  0x1e   : > { %525 = vrot.lane.b32.xlu1 %v418_v2, %s3534_s26  ;;  %523 = vrot.lane.b32.xlu0 %v417_v3, %s3534_s26 }
  0x22   : > { %612 = vrot.lane.b32.xlu1 %v418_v2, %s3535_s27  ;;  %610 = vrot.lane.b32.xlu0 %v417_v3, %s3535_s27 }
  0x26   : > { %699 = vrot.lane.b32.xlu1 %v3610_v4, %s3535_s27  ;;  %697 = vrot.lane.b32.xlu0 %v3595_v1, %s3535_s27 }
  0x2a   : > { %785 = vrot.lane.b32.xlu1 %v3610_v4, %s3536_s28  ;;  %783 = vrot.lane.b32.xlu0 %v3595_v1, %s3536_s28 }
  0x2e   : > { %870 = vrot.lane.b32.xlu1 %v3595_v1, %s3537_s29  ;;  %266 = vrot.lane.b32.xlu0 %v3610_v4, %s3533_s25 }
  0x32   : > { %268 = vrot.lane.b32.xlu1 %v3625_v5, %s3533_s25  ;;  %872 = vrot.lane.b32.xlu0 %v3610_v4, %s3537_s29 }
  0x36   : > { %441 = vrot.lane.b32.xlu1 %v419_v7, %s3532_s24  ;;  %354 = vrot.lane.b32.xlu0 %v3610_v4, %s3532_s24 }
  0x3a   : > { %443 = vrot.lane.b32.xlu1 %v420_v8, %s3532_s24  ;;  %356 = vrot.lane.b32.xlu0 %v3625_v5, %s3532_s24 }
  0x3e   : > { %614 = vrot.lane.b32.xlu1 %v419_v7, %s3535_s27  ;;  %527 = vrot.lane.b32.xlu0 %v419_v7, %s3534_s26 }
  0x42   : > { %616 = vrot.lane.b32.xlu1 %v420_v8, %s3535_s27  ;;  %529 = vrot.lane.b32.xlu0 %v420_v8, %s3534_s26  ;;  %v599_v8 = vld [vmem:[%s3585_s23 + $0x4c] sm:$0xf] }
  0x46   : > { %787 = vrot.lane.b32.xlu1 %v3625_v5, %s3536_s28  ;;  %701 = vrot.lane.b32.xlu0 %v3625_v5, %s3535_s27 }
  0x4a   : > { %789 = vrot.lane.b32.xlu1 %v3652_v9, %s3536_s28  ;;  %703 = vrot.lane.b32.xlu0 %v3652_v9, %s3535_s27 }
  0x4e   : > { %270 = vrot.lane.b32.xlu1 %v3652_v9, %s3533_s25  ;;  %874 = vrot.lane.b32.xlu0 %v3625_v5, %s3537_s29 }
  0x52   : > { %272 = vrot.lane.b32.xlu1 %v3663_v10, %s3533_s25  ;;  %876 = vrot.lane.b32.xlu0 %v3652_v9, %s3537_s29 }
  0x56   : > { %445 = vrot.lane.b32.xlu1 %v421_v11, %s3532_s24  ;;  %358 = vrot.lane.b32.xlu0 %v3652_v9, %s3532_s24 }
  0x5a   : > { %447 = vrot.lane.b32.xlu1 %v422_v12, %s3532_s24  ;;  %360 = vrot.lane.b32.xlu0 %v3663_v10, %s3532_s24 }
  0x5e   : > { %618 = vrot.lane.b32.xlu1 %v421_v11, %s3535_s27  ;;  %531 = vrot.lane.b32.xlu0 %v421_v11, %s3534_s26  ;;  %v512_v11 = vld [vmem:[%s3585_s23 + $0x4c] sm:$0xf] }
  0x62   : > { %620 = vrot.lane.b32.xlu1 %v422_v12, %s3535_s27  ;;  %533 = vrot.lane.b32.xlu0 %v422_v12, %s3534_s26 }
  0x66   : > { %791 = vrot.lane.b32.xlu1 %v3663_v10, %s3536_s28  ;;  %705 = vrot.lane.b32.xlu0 %v3663_v10, %s3535_s27 }
  0x6a   : > { %793 = vrot.lane.b32.xlu1 %v3686_v13, %s3536_s28  ;;  %707 = vrot.lane.b32.xlu0 %v3686_v13, %s3535_s27 }
  0x6e   : > { %274 = vrot.lane.b32.xlu1 %v3686_v13, %s3533_s25  ;;  %878 = vrot.lane.b32.xlu0 %v3663_v10, %s3537_s29 }
  0x72   : > { %276 = vrot.lane.b32.xlu1 %v3697_v14, %s3533_s25  ;;  %880 = vrot.lane.b32.xlu0 %v3686_v13, %s3537_s29 }
  0x76   : > { %449 = vrot.lane.b32.xlu1 %v423_v15, %s3532_s24  ;;  %362 = vrot.lane.b32.xlu0 %v3686_v13, %s3532_s24 }
  0x7a   : > { %451 = vrot.lane.b32.xlu1 %v424_v16, %s3532_s24  ;;  %364 = vrot.lane.b32.xlu0 %v3697_v14, %s3532_s24 }
  0x7e   : > { %622 = vrot.lane.b32.xlu1 %v423_v15, %s3535_s27  ;;  %535 = vrot.lane.b32.xlu0 %v423_v15, %s3534_s26 }
  0x82   : > { %624 = vrot.lane.b32.xlu1 %v424_v16, %s3535_s27  ;;  %537 = vrot.lane.b32.xlu0 %v424_v16, %s3534_s26 }
  0x84   : > { %v351_v17 = vpop.permute.xlu1 %350  ;;  %v263_v18 = vpop.permute.xlu0 %262 }
  0x85   : > { %v370_v20 = vrot.slane %v351_v17, 4  ;;  %v282_v23 = vrot.slane %v263_v18, 4 }
  0x86   : > { %795 = vrot.lane.b32.xlu1 %v3697_v14, %s3536_s28  ;;  %709 = vrot.lane.b32.xlu0 %v3697_v14, %s3535_s27 }
  0x88   : > { %v3722_v21 = vpop.permute.xlu1 %352  ;;  %v3724_v22 = vpop.permute.xlu0 %264 }
  0x89   : > { %v371_v24 = vrot.slane %v3722_v21, 4  ;;  %v283_v25 = vrot.slane %v3724_v22, 4 }
  0x8a   : > { %797 = vrot.lane.b32.xlu1 %v3720_v19, %s3536_s28  ;;  %711 = vrot.lane.b32.xlu0 %v3720_v19, %s3535_s27 }
  0x8b   : > { %v293_v26 = vsel %vm292_vm0, %v282_v23, %v283_v25  ;;  %v380_v28 = vsel %vm292_vm0, %v370_v20, %v371_v24 }
  0x8c   : > { %v3735_v27 = vpop.permute.xlu1 %439  ;;  %v438_v29 = vpop.permute.xlu0 %437  ;;  %v295_v30 = vsel %vm294_vm1, %v263_v18, %v293_v26  ;;  %v382_v37 = vsel %vm381_vm2, %v351_v17, %v380_v28  ;;  %v771_v28 = vld [vmem:[%s3585_s23 + $0x48] sm:$0xff] }
  0x8d   : > { %v458_v31 = vrot.slane %v3735_v27, 4  ;;  %v457_v32 = vrot.slane %v438_v29, 4  ;;  %v3302_v33 = vcombine.high %v3588_v0, %v295_v30  ;;  %v3301_v34 = vcombine.low %v3588_v0, %v295_v30 }
  0x8e   : > { %278 = vrot.lane.b32.xlu1 %v3720_v19, %s3533_s25  ;;  %882 = vrot.lane.b32.xlu0 %v3697_v14, %s3537_s29 }
  0x8f   : > { %v467_v35 = vsel %vm292_vm0, %v457_v32, %v458_v31  ;;  %1523 = vmatprep.subr.bf16.mxu0 %v3302_v33 }
  0x90   : > { %v468_v38 = vsel %vm381_vm2, %v438_v29, %v467_v35  ;;  %v3754_v39 = vpop.permute.xlu1 %525  ;;  %v524_v40 = vpop.permute.xlu0 %523  ;;  %1524 = vmatpush1.bf16.msra.mxu0 %v3301_v34 }
  0x91   : > { %v3319_v41 = vcombine.low %v382_v37, %v468_v38  ;;  %v3320_v42 = vcombine.high %v382_v37, %v468_v38  ;;  %v544_v43 = vrot.slane %v3754_v39, 4  ;;  %v543_v44 = vrot.slane %v524_v40, 4  ;;  %v772_v38 = vld [vmem:[%s3585_s23 + $0x50] sm:$0xf] }
  0x92   : > { %280 = vrot.lane.b32.xlu1 %v251_v36, %s3533_s25  ;;  %884 = vrot.lane.b32.xlu0 %v3720_v19, %s3537_s29 }
  0x93   : > { %1525 = vmatprep.subr.bf16.mxu0 %v3320_v42  ;;  %v553_v48 = vsel %vm292_vm0, %v543_v44, %v544_v43 }
  0x94   : > { %v3761_v46 = vpop.permute.xlu1 %612  ;;  %v611_v47 = vpop.permute.xlu0 %610  ;;  %1526 = vmatpush1.bf16.msra.mxu0 %v3319_v41  ;;  %v555_v54 = vsel %vm554_vm3, %v524_v40, %v553_v48  ;;  %v686_v40 = vld [vmem:[%s3585_s23 + $0x50] sm:$0xf] }
  0x95   : > { %v631_v49 = vrot.slane %v3761_v46, 4  ;;  %v630_v50 = vrot.slane %v611_v47, 4 }
  0x96   : > { %453 = vrot.lane.b32.xlu1 %v425_v45, %s3532_s24  ;;  %366 = vrot.lane.b32.xlu0 %v3720_v19, %s3532_s24 }
  0x97   : > { %v640_v51 = vsel %vm292_vm0, %v630_v50, %v631_v49 }
  0x98   : > { %v642_v55 = vsel %vm641_vm4, %v611_v47, %v640_v51  ;;  %v3777_v56 = vpop.permute.xlu1 %699  ;;  %v698_v57 = vpop.permute.xlu0 %697 }
  0x99   : > { %v3337_v58 = vcombine.low %v555_v54, %v642_v55  ;;  %v3338_v59 = vcombine.high %v555_v54, %v642_v55  ;;  %v718_v60 = vrot.slane %v3777_v56, 4  ;;  %v717_v61 = vrot.slane %v698_v57, 4  ;;  %v859_v55 = vld [vmem:[%s3585_s23 + $0x50] sm:$0xf]  ;;  %s3502_s23 = smul.u32 18, %s4512_s19 }
  0x9a   : > { %455 = vrot.lane.b32.xlu1 %v426_v52, %s3532_s24  ;;  %368 = vrot.lane.b32.xlu0 %v339_v53, %s3532_s24 }
  0x9b   : > { %1527 = vmatprep.subr.bf16.mxu0 %v3338_v59  ;;  %v727_v0 = vsel %vm292_vm0, %v717_v61, %v718_v60  ;;  %s4458_s25 = scalar_lea.vmem %s4510_s5, %s3502_s23 }
  0x9c   : > { %v3782_v62 = vpop.permute.xlu1 %785  ;;  %v784_v63 = vpop.permute.xlu0 %783  ;;  %1528 = vmatpush1.bf16.msra.mxu0 %v3337_v58  ;;  %v728_v12 = vsel %vm641_vm4, %v698_v57, %v727_v0  ;;  %v3840_v57 = vld [vmem:[%s4506_s1] sm:$0xff]  }
  0x9d   : > { %v804_v2 = vrot.slane %v3782_v62, 4  ;;  %v803_v3 = vrot.slane %v784_v63, 4 }
  0x9e   : > { %626 = vrot.lane.b32.xlu1 %v425_v45, %s3535_s27  ;;  %539 = vrot.lane.b32.xlu0 %v425_v45, %s3534_s26 }
  0x9f   : > { %v813_v7 = vsel %vm292_vm0, %v803_v3, %v804_v2 }
  0xa0   : > { %v815_v15 = vsel %vm814_vm5, %v784_v63, %v813_v7  ;;  %v871_v16 = vpop.permute.xlu1 %870  ;;  %v267_v17 = vpop.permute.xlu0 %266 }
  0xa1   : > { %v3355_v18 = vcombine.low %v728_v12, %v815_v15  ;;  %v3356_v20 = vcombine.high %v728_v12, %v815_v15  ;;  %v284_v23 = vrot.slane %v267_v17, 4  ;;  %v890_v26 = vrot.slane %v871_v16, 4 }
  0xa2   : > { %628 = vrot.lane.b32.xlu1 %v599_v8, %s3535_s27  ;;  %541 = vrot.lane.b32.xlu0 %v512_v11, %s3534_s26  ;;  %v1022_v8 = vld [vmem:[%s4507_s2] sm:$0xff] }
  0xa3   : > { %1529 = vmatprep.subr.bf16.mxu0 %v3356_v20  ;;  %v296_v29 = vsel %vm292_vm0, %v283_v25, %v284_v23 }
  0xa4   : > { %v3803_v30 = vpop.permute.xlu1 %268  ;;  %v3805_v32 = vpop.permute.xlu0 %872  ;;  %1530 = vmatpush1.bf16.msra.mxu0 %v3355_v18  ;;  %v297_v33 = vsel %vm294_vm1, %v3724_v22, %v296_v29  ;;  %v3881_v29 = vld [vmem:[%s4506_s1 + $0x8] sm:$0xff]  }
  0xa5   : > { %v285_v34 = vrot.slane %v3803_v30, 4  ;;  %v891_v35 = vrot.slane %v3805_v32, 4  ;;  %v3304_v36 = vcombine.high %v3595_v1, %v297_v33  ;;  %v3303_v37 = vcombine.low %v3595_v1, %v297_v33  ;;  %v1024_v33 = vld [vmem:[%s4507_s2 + $0x10] sm:$0xff] }
  0xa6   : > { %799 = vrot.lane.b32.xlu1 %v771_v28, %s3536_s28  ;;  %713 = vrot.lane.b32.xlu0 %v771_v28, %s3535_s27 }
  0xa7   : > { %v298_v25 = vsel %vm292_vm0, %v284_v23, %v285_v34  ;;  %v900_v22 = vsel %vm292_vm0, %v890_v26, %v891_v35  ;;  %1576 = vmatprep.subr.bf16.mxu1 %v3304_v36  ;;  %v1025_v36 = vld [vmem:[%s4507_s2 + $0x18] sm:$0xff] }
  0xa8   : > { %v442_v41 = vpop.permute.xlu1 %441  ;;  %v355_v42 = vpop.permute.xlu0 %354  ;;  %1577 = vmatpush1.bf16.msra.mxu1 %v3303_v37  ;;  %v902_v1 = vsel %vm901_vm6, %v871_v16, %v900_v22  ;;  %v299_v44 = vsel %vm294_vm1, %v267_v17, %v298_v25 }
  0xa9   : > { %v459_v45 = vrot.slane %v442_v41, 4  ;;  %v372_v47 = vrot.slane %v355_v42, 4  ;;  %v3374_v48 = vcombine.high %v902_v1, %v902_v1  ;;  %v3373_v50 = vcombine.low %v902_v1, %v902_v1 }
  0xaa   : > { %801 = vrot.lane.b32.xlu1 %v772_v38, %s3536_s28  ;;  %715 = vrot.lane.b32.xlu0 %v686_v40, %s3535_s27  ;;  %v3306_v54 = vcombine.high %v3610_v4, %v299_v44  ;;  %v3305_v7 = vcombine.low %v3610_v4, %v299_v44  ;;  %v1023_v4 = vld [vmem:[%s4507_s2 + $0x8] sm:$0xff] }
  0xab   : > { %v469_v51 = vsel %vm292_vm0, %v458_v31, %v459_v45  ;;  %v383_v52 = vsel %vm292_vm0, %v371_v24, %v372_v47  ;;  %3391 = vmatprep.subr.msk.bf16.mxu0 %vm292_vm0, %v3374_v48  ;;  %v1470_v53 = vsel %vm292_vm0, %v3373_v50, 0 }
  0xac   : > { %v3842_v58 = vpop.permute.xlu1 %443  ;;  %v3844_v59 = vpop.permute.xlu0 %356  ;;  %1532 = vmatpush1.bf16.msra.mxu0 %v1470_v53  ;;  %v384_v24 = vsel %vm381_vm2, %v3722_v21, %v383_v52  ;;  %v470_v31 = vsel %vm381_vm2, %v3735_v27, %v469_v51 }
  0xad   : > { %v460_v61 = vrot.slane %v3842_v58, 4  ;;  %v373_v63 = vrot.slane %v3844_v59, 4  ;;  %1629 = vmatprep.subr.bf16.mxu0 %v3306_v54  ;;  %v3322_v0 = vcombine.high %v384_v24, %v470_v31  ;;  %v3321_v3 = vcombine.low %v384_v24, %v470_v31 }
  0xae   : > { %888 = vrot.lane.b32.xlu1 %v859_v55, %s3537_s29  ;;  %886 = vrot.lane.b32.xlu0 %v771_v28, %s3537_s29 }
  0xaf   : > { %v471_v21 = vsel %vm292_vm0, %v459_v45, %v460_v61  ;;  %v385_v27 = vsel %vm292_vm0, %v372_v47, %v373_v63  ;;  %3392 = vmatmul.mubr.msk.bf16.vlgmr.msra.gmra.mrb[0].mxu0 %vm1461_vm7, %v3840_v57  ;;  %1578 = vmatprep.subr.bf16.mxu1 %v3322_v0 }
  0xb0   : > { %v615_v11 = vpop.permute.xlu1 %614  ;;  %v528_v12 = vpop.permute.xlu0 %527  ;;  %1579 = vmatpush1.bf16.msra.mxu1 %v3321_v3  ;;  %1630 = vmatpush1.bf16.msra.mxu0 %v3305_v7  ;;  %v386_v15 = vsel %vm381_vm2, %v355_v42, %v385_v27  ;;  %v472_v16 = vsel %vm381_vm2, %v442_v41, %v471_v21 }
  0xb1   : > { %v632_v17 = vrot.slane %v615_v11, 4  ;;  %v545_v18 = vrot.slane %v528_v12, 4  ;;  %v3323_v20 = vcombine.low %v386_v15, %v472_v16  ;;  %v3324_v23 = vcombine.high %v386_v15, %v472_v16  ;;  %1565 = vmatprep.mubr.bf16.mxu0 %v3538_v6 }
  0xb2   : > { %1033 = vperm.xlu1 %3521, %v1023_v4   ;;  %1028 = vperm.xlu0 %3520, %v1022_v8  }
  0xb3   : > { %v643_v26 = vsel %vm292_vm0, %v631_v49, %v632_v17  ;;  %v556_v28 = vsel %vm292_vm0, %v544_v43, %v545_v18  ;;  %1631 = vmatprep.subr.bf16.mxu0 %v3324_v23 }
  0xb4   : > { %v3889_v37 = vpop.permute.xlu1 %616  ;;  %v3891_v49 = vpop.permute.xlu0 %529  ;;  %1632 = vmatpush1.bf16.msra.mxu0 %v3323_v20  ;;  %v557_v43 = vsel %vm554_vm3, %v3754_v39, %v556_v28  ;;  %v644_v25 = vsel %vm641_vm4, %v3761_v46, %v643_v26  ;;  %v2073_v39 = vld [vmem:[%s4509_s4] sm:$0xff] }
  0xb5   : > { %v633_v22 = vrot.slane %v3889_v37, 4  ;;  %v546_v38 = vrot.slane %v3891_v49, 4  ;;  %v3340_v40 = vcombine.high %v557_v43, %v644_v25  ;;  %v3339_v41 = vcombine.low %v557_v43, %v644_v25 }
  0xb6   : > { %1038 = vperm.xlu1 %3521, %v1024_v33   ;;  %1043 = vperm.xlu0 %3520, %v1025_v36  }
  0xb7   : > { %v645_v42 = vsel %vm292_vm0, %v632_v17, %v633_v22  ;;  %v558_v1 = vsel %vm292_vm0, %v545_v18, %v546_v38  ;;  %3393 = vmatmul.mubr.msk.bf16.gmra.mrb[4].mxu0 %vm1461_vm7, %v3881_v29  ;;  %1580 = vmatprep.subr.bf16.mxu1 %v3340_v40 }
  0xb8   : > { %v788_v46 = vpop.permute.xlu1 %787  ;;  %v702_v44 = vpop.permute.xlu0 %701  ;;  %1581 = vmatpush1.bf16.msra.mxu1 %v3339_v41  ;;  %v559_v45 = vsel %vm554_vm3, %v528_v12, %v558_v1  ;;  %v646_v47 = vsel %vm641_vm4, %v615_v11, %v645_v42  ;;  %1661 = vmatprep.mubr.bf16.mxu0 %v3538_v6 }
  0xb9   : > { %v805_v48 = vrot.slane %v788_v46, 4  ;;  %v719_v50 = vrot.slane %v702_v44, 4  ;;  %v3341_v51 = vcombine.low %v559_v45, %v646_v47  ;;  %v3342_v52 = vcombine.high %v559_v45, %v646_v47 }
  0xba   : > { %2076 = vperm.xlu1 %3521, %v2073_v39  }
  0xbb   : > { %v816_v53 = vsel %vm292_vm0, %v804_v2, %v805_v48  ;;  %v729_v54 = vsel %vm292_vm0, %v718_v60, %v719_v50  ;;  %1633 = vmatprep.subr.bf16.mxu0 %v3342_v52 }
  0xbc   : > { %v3919_v55 = vpop.permute.xlu1 %789  ;;  %v3921_v24 = vpop.permute.xlu0 %703  ;;  %1634 = vmatpush1.bf16.msra.mxu0 %v3341_v51  ;;  %v730_v31 = vsel %vm641_vm4, %v3777_v56, %v729_v54  ;;  %v817_v0 = vsel %vm814_vm5, %v3782_v62, %v816_v53 }
  0xbd   : > { %v806_v3 = vrot.slane %v3919_v55, 4  ;;  %v720_v2 = vrot.slane %v3921_v24, 4  ;;  %v3358_v7 = vcombine.high %v730_v31, %v817_v0  ;;  %v3357_v21 = vcombine.low %v730_v31, %v817_v0 }
  0xbf   : > { %v818_v60 = vsel %vm292_vm0, %v805_v48, %v806_v3  ;;  %v731_v27 = vsel %vm292_vm0, %v719_v50, %v720_v2  ;;  %1582 = vmatprep.subr.bf16.mxu1 %v3358_v7 }
  0xc0   : > { %v271_v4 = vpop.permute.xlu1 %270  ;;  %v875_v56 = vpop.permute.xlu0 %874  ;;  %1583 = vmatpush1.bf16.msra.mxu1 %v3357_v21  ;;  %v732_v62 = vsel %vm641_vm4, %v702_v44, %v731_v27  ;;  %v819_v8 = vsel %vm814_vm5, %v788_v46, %v818_v60 }
  0xc1   : > { %v286_v11 = vrot.slane %v271_v4, 4  ;;  %v892_v12 = vrot.slane %v875_v56, 4  ;;  %v3359_v15 = vcombine.low %v732_v62, %v819_v8  ;;  %v3360_v16 = vcombine.high %v732_v62, %v819_v8 }
  0xc3   : > { %v300_v17 = vsel %vm292_vm0, %v285_v34, %v286_v11  ;;  %v903_v18 = vsel %vm292_vm0, %v891_v35, %v892_v12  ;;  %1635 = vmatprep.subr.bf16.mxu0 %v3360_v16 }
  0xc4   : > { %v3943_v20 = vpop.permute.xlu1 %272  ;;  %v3945_v23 = vpop.permute.xlu0 %876  ;;  %1636 = vmatpush1.bf16.msra.mxu0 %v3359_v15  ;;  %v904_v26 = vsel %vm901_vm6, %v3805_v32, %v903_v18  ;;  %v301_v28 = vsel %vm294_vm1, %v3803_v30, %v300_v17 }
  0xc5   : > { %v287_v33 = vrot.slane %v3943_v20, 4  ;;  %v893_v34 = vrot.slane %v3945_v23, 4  ;;  %v3376_v36 = vcombine.high %v904_v26, %v904_v26  ;;  %v3375_v43 = vcombine.low %v904_v26, %v904_v26 }
  0xc6   : > { %v3308_v30 = vcombine.high %v3625_v5, %v301_v28  ;;  %v3307_v47 = vcombine.low %v3625_v5, %v301_v28 }
  0xc7   : > { %v302_v35 = vsel %vm292_vm0, %v286_v11, %v287_v33  ;;  %v905_v25 = vsel %vm292_vm0, %v892_v12, %v893_v34  ;;  %3394 = vmatprep.subr.msk.bf16.mxu1 %vm292_vm0, %v3376_v36  ;;  %v1476_v32 = vsel %vm292_vm0, %v3375_v43, 0 }
  0xc8   : > { %v446_v40 = vpop.permute.xlu1 %445  ;;  %v359_v41 = vpop.permute.xlu0 %358  ;;  %1585 = vmatpush1.bf16.msra.mxu1 %v1476_v32  ;;  %v906_v42 = vsel %vm901_vm6, %v875_v56, %v905_v25  ;;  %v303_v1 = vsel %vm294_vm1, %v271_v4, %v302_v35 }
  0xc9   : > { %v461_v39 = vrot.slane %v446_v40, 4  ;;  %v374_v46 = vrot.slane %v359_v41, 4  ;;  %1682 = vmatprep.subr.bf16.mxu1 %v3308_v30  ;;  %v3378_v44 = vcombine.high %v906_v42, %v906_v42  ;;  %v3377_v45 = vcombine.low %v906_v42, %v906_v42 }
  0xca   : > { %v3310_v52 = vcombine.high %v3652_v9, %v303_v1  ;;  %v3309_v21 = vcombine.low %v3652_v9, %v303_v1 }
  0xcb   : > { %v473_v48 = vsel %vm292_vm0, %v460_v61, %v461_v39  ;;  %v387_v50 = vsel %vm292_vm0, %v373_v63, %v374_v46  ;;  %3395 = vmatmul.mubr.msk.bf16.vlgmr.msra.gmra.mrb[0].mxu1 %vm1461_vm7, %v3840_v57  ;;  %3397 = vmatprep.subr.msk.bf16.mxu0 %vm292_vm0, %v3378_v44  ;;  %v1482_v51 = vsel %vm292_vm0, %v3377_v45, 0 }
  0xcc   : > { %v3976_v53 = vpop.permute.xlu1 %447  ;;  %v3978_v5 = vpop.permute.xlu0 %360  ;;  %1638 = vmatpush1.bf16.msra.mxu0 %v1482_v51  ;;  %1683 = vmatpush1.bf16.msra.mxu1 %v3307_v47  ;;  %v388_v61 = vsel %vm381_vm2, %v3844_v59, %v387_v50  ;;  %v474_v63 = vsel %vm381_vm2, %v3842_v58, %v473_v48 }
  0xcd   : > { %v462_v54 = vrot.slane %v3976_v53, 4  ;;  %v375_v31 = vrot.slane %v3978_v5, 4  ;;  %1735 = vmatprep.subr.bf16.mxu0 %v3310_v52  ;;  %v3325_v0 = vcombine.low %v388_v61, %v474_v63  ;;  %v3326_v7 = vcombine.high %v388_v61, %v474_v63  ;;  %1618 = vmatprep.mubr.bf16.mxu1 %v3538_v6 }
  0xcf   : > { %v475_v60 = vsel %vm292_vm0, %v461_v39, %v462_v54  ;;  %v389_v59 = vsel %vm292_vm0, %v374_v46, %v375_v31  ;;  %1684 = vmatprep.subr.bf16.mxu1 %v3326_v7  ;;  %3398 = vmatmul.mubr.msk.bf16.vlgmr.msra.gmra.mrb[8].mxu0 %vm1461_vm7, %v3840_v57 }
  0xd0   : > { %v619_v58 = vpop.permute.xlu1 %618  ;;  %v532_v27 = vpop.permute.xlu0 %531  ;;  %1685 = vmatpush1.bf16.msra.mxu1 %v3325_v0  ;;  %1736 = vmatpush1.bf16.msra.mxu0 %v3309_v21  ;;  %v390_v4 = vsel %vm381_vm2, %v359_v41, %v389_v59  ;;  %v476_v9 = vsel %vm381_vm2, %v446_v40, %v475_v60 }
  0xd1   : > { %v634_v56 = vrot.slane %v619_v58, 4  ;;  %v547_v62 = vrot.slane %v532_v27, 4  ;;  %v3327_v8 = vcombine.low %v390_v4, %v476_v9  ;;  %v3328_v11 = vcombine.high %v390_v4, %v476_v9  ;;  %1671 = vmatprep.mubr.bf16.mxu0 %v3538_v6 }
  0xd3   : > { %v647_v12 = vsel %vm292_vm0, %v633_v22, %v634_v56  ;;  %v560_v15 = vsel %vm292_vm0, %v546_v38, %v547_v62  ;;  %3396 = vmatmul.mubr.msk.bf16.gmra.mrb[4].mxu1 %vm1461_vm7, %v3881_v29  ;;  %1737 = vmatprep.subr.bf16.mxu0 %v3328_v11 }
  0xd4   : > { %v4007_v16 = vpop.permute.xlu1 %620  ;;  %v4009_v17 = vpop.permute.xlu0 %533  ;;  %1738 = vmatpush1.bf16.msra.mxu0 %v3327_v8  ;;  %v561_v18 = vsel %vm554_vm3, %v3891_v49, %v560_v15  ;;  %v648_v26 = vsel %vm641_vm4, %v3889_v37, %v647_v12  ;;  %1714 = vmatprep.mubr.bf16.mxu1 %v3538_v6 }
  0xd5   : > { %v635_v22 = vrot.slane %v4007_v16, 4  ;;  %v548_v38 = vrot.slane %v4009_v17, 4  ;;  %v3343_v28 = vcombine.low %v561_v18, %v648_v26  ;;  %v3344_v36 = vcombine.high %v561_v18, %v648_v26 }
  0xd7   : > { %v649_v43 = vsel %vm292_vm0, %v634_v56, %v635_v22  ;;  %v562_v35 = vsel %vm292_vm0, %v547_v62, %v548_v38  ;;  %1686 = vmatprep.subr.bf16.mxu1 %v3344_v36  ;;  %3399 = vmatmul.mubr.msk.bf16.gmra.mrb[12].mxu0 %vm1461_vm7, %v3881_v29 }
  0xd8   : > { %v792_v37 = vpop.permute.xlu1 %791  ;;  %v706_v49 = vpop.permute.xlu0 %705  ;;  %1687 = vmatpush1.bf16.msra.mxu1 %v3343_v28  ;;  %v563_v25 = vsel %vm554_vm3, %v532_v27, %v562_v35  ;;  %v650_v32 = vsel %vm641_vm4, %v619_v58, %v649_v43  ;;  %1767 = vmatprep.mubr.bf16.mxu0 %v3538_v6 }
  0xd9   : > { %v807_v30 = vrot.slane %v792_v37, 4  ;;  %v721_v40 = vrot.slane %v706_v49, 4  ;;  %v3345_v41 = vcombine.low %v563_v25, %v650_v32  ;;  %v3346_v42 = vcombine.high %v563_v25, %v650_v32 }
  0xdb   : > { %v820_v1 = vsel %vm292_vm0, %v806_v3, %v807_v30  ;;  %v733_v39 = vsel %vm292_vm0, %v720_v2, %v721_v40  ;;  %1739 = vmatprep.subr.bf16.mxu0 %v3346_v42 }
  0xdc   : > { %v4035_v46 = vpop.permute.xlu1 %793  ;;  %v4037_v44 = vpop.permute.xlu0 %707  ;;  %1740 = vmatpush1.bf16.msra.mxu0 %v3345_v41  ;;  %v734_v45 = vsel %vm641_vm4, %v3921_v24, %v733_v39  ;;  %v821_v47 = vsel %vm814_vm5, %v3919_v55, %v820_v1 }
  0xdd   : > { %v808_v48 = vrot.slane %v4035_v46, 4  ;;  %v722_v3 = vrot.slane %v4037_v44, 4  ;;  %v3361_v50 = vcombine.low %v734_v45, %v821_v47  ;;  %v3362_v51 = vcombine.high %v734_v45, %v821_v47 }
  0xdf   : > { %v822_v2 = vsel %vm292_vm0, %v807_v30, %v808_v48  ;;  %v735_v52 = vsel %vm292_vm0, %v721_v40, %v722_v3  ;;  %1688 = vmatprep.subr.bf16.mxu1 %v3362_v51 }
  0xe0   : > { %v275_v61 = vpop.permute.xlu1 %274  ;;  %v879_v24 = vpop.permute.xlu0 %878  ;;  %1689 = vmatpush1.bf16.msra.mxu1 %v3361_v50  ;;  %v736_v55 = vsel %vm641_vm4, %v706_v49, %v735_v52  ;;  %v823_v63 = vsel %vm814_vm5, %v792_v37, %v822_v2 }
  0xe1   : > { %v288_v0 = vrot.slane %v275_v61, 4  ;;  %v894_v7 = vrot.slane %v879_v24, 4  ;;  %v3363_v21 = vcombine.low %v736_v55, %v823_v63  ;;  %v3364_v60 = vcombine.high %v736_v55, %v823_v63 }
  0xe3   : > { %v304_v59 = vsel %vm292_vm0, %v287_v33, %v288_v0  ;;  %v907_v58 = vsel %vm292_vm0, %v893_v34, %v894_v7  ;;  %1741 = vmatprep.subr.bf16.mxu0 %v3364_v60 }
  0xe4   : > { %v4059_v27 = vpop.permute.xlu1 %276  ;;  %v4061_v4 = vpop.permute.xlu0 %880  ;;  %1742 = vmatpush1.bf16.msra.mxu0 %v3363_v21  ;;  %v908_v9 = vsel %vm901_vm6, %v3945_v23, %v907_v58  ;;  %v305_v56 = vsel %vm294_vm1, %v3943_v20, %v304_v59 }
  0xe5   : > { %v289_v62 = vrot.slane %v4059_v27, 4  ;;  %v895_v33 = vrot.slane %v4061_v4, 4  ;;  %v3380_v8 = vcombine.high %v908_v9, %v908_v9  ;;  %v3379_v11 = vcombine.low %v908_v9, %v908_v9 }
  0xe6   : > { %v3312_v20 = vcombine.high %v3663_v10, %v305_v56  ;;  %v3311_v49 = vcombine.low %v3663_v10, %v305_v56 }
  0xe7   : > { %v306_v34 = vsel %vm292_vm0, %v288_v0, %v289_v62  ;;  %v909_v12 = vsel %vm292_vm0, %v894_v7, %v895_v33  ;;  %3400 = vmatprep.subr.msk.bf16.mxu1 %vm292_vm0, %v3380_v8  ;;  %v1488_v23 = vsel %vm292_vm0, %v3379_v11, 0 }
  0xe8   : > { %v450_v15 = vpop.permute.xlu1 %449  ;;  %v363_v18 = vpop.permute.xlu0 %362  ;;  %1691 = vmatpush1.bf16.msra.mxu1 %v1488_v23  ;;  %v910_v26 = vsel %vm901_vm6, %v879_v24, %v909_v12  ;;  %v307_v28 = vsel %vm294_vm1, %v275_v61, %v306_v34 }
  0xe9   : > { %v463_v36 = vrot.slane %v450_v15, 4  ;;  %v376_v43 = vrot.slane %v363_v18, 4  ;;  %1788 = vmatprep.subr.bf16.mxu1 %v3312_v20  ;;  %v3382_v35 = vcombine.high %v910_v26, %v910_v26  ;;  %v3381_v37 = vcombine.low %v910_v26, %v910_v26 }
  0xea   : > { %v3314_v40 = vcombine.high %v3686_v13, %v307_v28  ;;  %v3313_v47 = vcombine.low %v3686_v13, %v307_v28 }
  0xeb   : > { %v477_v25 = vsel %vm292_vm0, %v462_v54, %v463_v36  ;;  %v391_v32 = vsel %vm292_vm0, %v375_v31, %v376_v43  ;;  %3401 = vmatmul.mubr.msk.bf16.vlgmr.msra.gmra.mrb[8].mxu1 %vm1461_vm7, %v3840_v57  ;;  %3403 = vmatprep.subr.msk.bf16.mxu0 %vm292_vm0, %v3382_v35  ;;  %v1494_v30 = vsel %vm292_vm0, %v3381_v37, 0 }
  0xec   : > { %v4092_v41 = vpop.permute.xlu1 %451  ;;  %v4094_v10 = vpop.permute.xlu0 %364  ;;  %1744 = vmatpush1.bf16.msra.mxu0 %v1494_v30  ;;  %1789 = vmatpush1.bf16.msra.mxu1 %v3311_v49  ;;  %v392_v54 = vsel %vm381_vm2, %v3978_v5, %v391_v32  ;;  %v478_v31 = vsel %vm381_vm2, %v3976_v53, %v477_v25 }
  0xed   : > { %v464_v42 = vrot.slane %v4092_v41, 4  ;;  %v377_v1 = vrot.slane %v4094_v10, 4  ;;  %1841 = vmatprep.subr.bf16.mxu0 %v3314_v40  ;;  %v3329_v39 = vcombine.low %v392_v54, %v478_v31  ;;  %v3330_v45 = vcombine.high %v392_v54, %v478_v31  ;;  %1724 = vmatprep.mubr.bf16.mxu1 %v3538_v6 }
  0xef   : > { %v479_v50 = vsel %vm292_vm0, %v463_v36, %v464_v42  ;;  %v393_v5 = vsel %vm292_vm0, %v376_v43, %v377_v1  ;;  %3404 = vmatmul.mubr.msk.bf16.vlgmr.msra.gmra.mrb[16].mxu0 %vm1461_vm7, %v3840_v57  ;;  %1790 = vmatprep.subr.bf16.mxu1 %v3330_v45 }
  0xf0   : > { %v623_v53 = vpop.permute.xlu1 %622  ;;  %v536_v51 = vpop.permute.xlu0 %535  ;;  %1791 = vmatpush1.bf16.msra.mxu1 %v3329_v39  ;;  %1842 = vmatpush1.bf16.msra.mxu0 %v3313_v47  ;;  %v394_v2 = vsel %vm381_vm2, %v363_v18, %v393_v5  ;;  %v480_v13 = vsel %vm381_vm2, %v450_v15, %v479_v50 }
  0xf1   : > { %v636_v52 = vrot.slane %v623_v53, 4  ;;  %v549_v61 = vrot.slane %v536_v51, 4  ;;  %v3331_v24 = vcombine.low %v394_v2, %v480_v13  ;;  %v3332_v55 = vcombine.high %v394_v2, %v480_v13  ;;  %1777 = vmatprep.mubr.bf16.mxu0 %v3538_v6 }
  0xf3   : > { %v651_v63 = vsel %vm292_vm0, %v635_v22, %v636_v52  ;;  %v564_v0 = vsel %vm292_vm0, %v548_v38, %v549_v61  ;;  %3402 = vmatmul.mubr.msk.bf16.gmra.mrb[12].mxu1 %vm1461_vm7, %v3881_v29  ;;  %1843 = vmatprep.subr.bf16.mxu0 %v3332_v55 }
  0xf4   : > { %v4123_v7 = vpop.permute.xlu1 %624  ;;  %v4125_v21 = vpop.permute.xlu0 %537  ;;  %1844 = vmatpush1.bf16.msra.mxu0 %v3331_v24  ;;  %v565_v60 = vsel %vm554_vm3, %v4009_v17, %v564_v0  ;;  %v652_v59 = vsel %vm641_vm4, %v4007_v16, %v651_v63  ;;  %1820 = vmatprep.mubr.bf16.mxu1 %v3538_v6 }
  0xf5   : > { %v637_v22 = vrot.slane %v4123_v7, 4  ;;  %v550_v38 = vrot.slane %v4125_v21, 4  ;;  %v3347_v58 = vcombine.low %v565_v60, %v652_v59  ;;  %v3348_v9 = vcombine.high %v565_v60, %v652_v59 }
  0xf7   : > { %v653_v56 = vsel %vm292_vm0, %v636_v52, %v637_v22  ;;  %v566_v8 = vsel %vm292_vm0, %v549_v61, %v550_v38  ;;  %3405 = vmatmul.mubr.msk.bf16.gmra.mrb[20].mxu0 %vm1461_vm7, %v3881_v29  ;;  %1792 = vmatprep.subr.bf16.mxu1 %v3348_v9 }
  0xf8   : > { %v796_v16 = vpop.permute.xlu1 %795  ;;  %v710_v17 = vpop.permute.xlu0 %709  ;;  %1793 = vmatpush1.bf16.msra.mxu1 %v3347_v58  ;;  %v567_v11 = vsel %vm554_vm3, %v536_v51, %v566_v8  ;;  %v654_v34 = vsel %vm641_vm4, %v623_v53, %v653_v56  ;;  %1873 = vmatprep.mubr.bf16.mxu0 %v3538_v6 }
  0xf9   : > { %v809_v12 = vrot.slane %v796_v16, 4  ;;  %v723_v23 = vrot.slane %v710_v17, 4  ;;  %v3349_v20 = vcombine.low %v567_v11, %v654_v34  ;;  %v3350_v15 = vcombine.high %v567_v11, %v654_v34 }
  0xfb   : > { %v824_v18 = vsel %vm292_vm0, %v808_v48, %v809_v12  ;;  %v737_v26 = vsel %vm292_vm0, %v722_v3, %v723_v23  ;;  %1845 = vmatprep.subr.bf16.mxu0 %v3350_v15 }
  0xfc   : > { %v4151_v28 = vpop.permute.xlu1 %797  ;;  %v4153_v36 = vpop.permute.xlu0 %711  ;;  %1846 = vmatpush1.bf16.msra.mxu0 %v3349_v20  ;;  %v738_v43 = vsel %vm641_vm4, %v4037_v44, %v737_v26  ;;  %v825_v35 = vsel %vm814_vm5, %v4035_v46, %v824_v18 }
  0xfd   : > { %v810_v37 = vrot.slane %v4151_v28, 4  ;;  %v724_v48 = vrot.slane %v4153_v36, 4  ;;  %v3365_v49 = vcombine.low %v738_v43, %v825_v35  ;;  %v3366_v25 = vcombine.high %v738_v43, %v825_v35 }
  0xff   : > { %v826_v3 = vsel %vm292_vm0, %v809_v12, %v810_v37  ;;  %v739_v32 = vsel %vm292_vm0, %v723_v23, %v724_v48  ;;  %1794 = vmatprep.subr.bf16.mxu1 %v3366_v25 }
 0x100   : > { %v279_v30 = vpop.permute.xlu1 %278  ;;  %v883_v44 = vpop.permute.xlu0 %882  ;;  %1795 = vmatpush1.bf16.msra.mxu1 %v3365_v49  ;;  %v740_v46 = vsel %vm641_vm4, %v710_v17, %v739_v32  ;;  %v827_v40 = vsel %vm814_vm5, %v796_v16, %v826_v3 }
 0x101   : > { %v290_v54 = vrot.slane %v279_v30, 4  ;;  %v896_v31 = vrot.slane %v883_v44, 4  ;;  %v3367_v39 = vcombine.low %v740_v46, %v827_v40  ;;  %v3368_v45 = vcombine.high %v740_v46, %v827_v40 }
 0x103   : > { %v308_v47 = vsel %vm292_vm0, %v289_v62, %v290_v54  ;;  %v911_v50 = vsel %vm292_vm0, %v895_v33, %v896_v31  ;;  %1847 = vmatprep.subr.bf16.mxu0 %v3368_v45 }
 0x104   : > { %v281_v5 = vpop.permute.xlu1 %280  ;;  %v4175_v53 = vpop.permute.xlu0 %884  ;;  %1848 = vmatpush1.bf16.msra.mxu0 %v3367_v39  ;;  %v912_v51 = vsel %vm901_vm6, %v4061_v4, %v911_v50  ;;  %v309_v2 = vsel %vm294_vm1, %v4059_v27, %v308_v47 }
 0x105   : > { %v291_v13 = vrot.slane %v281_v5, 4  ;;  %v897_v52 = vrot.slane %v4175_v53, 4  ;;  %v3384_v61 = vcombine.high %v912_v51, %v912_v51  ;;  %v3383_v62 = vcombine.low %v912_v51, %v912_v51 }
 0x106   : > { %v3316_v4 = vcombine.high %v3697_v14, %v309_v2  ;;  %v3315_v8 = vcombine.low %v3697_v14, %v309_v2 }
 0x107   : > { %v310_v24 = vsel %vm292_vm0, %v290_v54, %v291_v13  ;;  %v913_v33 = vsel %vm292_vm0, %v896_v31, %v897_v52  ;;  %3406 = vmatprep.subr.msk.bf16.mxu1 %vm292_vm0, %v3384_v61  ;;  %v1500_v55 = vsel %vm292_vm0, %v3383_v62, 0 }
 0x108   : > { %v454_v63 = vpop.permute.xlu1 %453  ;;  %v367_v0 = vpop.permute.xlu0 %366  ;;  %1797 = vmatpush1.bf16.msra.mxu1 %v1500_v55  ;;  %v914_v27 = vsel %vm901_vm6, %v883_v44, %v913_v33  ;;  %v311_v60 = vsel %vm294_vm1, %v279_v30, %v310_v24 }
 0x109   : > { %v465_v59 = vrot.slane %v454_v63, 4  ;;  %v378_v58 = vrot.slane %v367_v0, 4  ;;  %1894 = vmatprep.subr.bf16.mxu1 %v3316_v4  ;;  %v3386_v9 = vcombine.high %v914_v27, %v914_v27  ;;  %v3385_v56 = vcombine.low %v914_v27, %v914_v27 }
 0x10a   : > { %v3318_v34 = vcombine.high %v3720_v19, %v311_v60  ;;  %v3317_v26 = vcombine.low %v3720_v19, %v311_v60 }
 0x10b   : > { %v481_v16 = vsel %vm292_vm0, %v464_v42, %v465_v59  ;;  %v395_v17 = vsel %vm292_vm0, %v377_v1, %v378_v58  ;;  %3407 = vmatmul.mubr.msk.bf16.vlgmr.msra.gmra.mrb[16].mxu1 %vm1461_vm7, %v3840_v57  ;;  %3409 = vmatprep.subr.msk.bf16.mxu0 %vm292_vm0, %v3386_v9  ;;  %v1506_v11 = vsel %vm292_vm0, %v3385_v56, 0 }
 0x10c   : > { %v456_v12 = vpop.permute.xlu1 %455  ;;  %v369_v23 = vpop.permute.xlu0 %368  ;;  %1850 = vmatpush1.bf16.msra.mxu0 %v1506_v11  ;;  %1895 = vmatpush1.bf16.msra.mxu1 %v3315_v8  ;;  %v396_v14 = vsel %vm381_vm2, %v4094_v10, %v395_v17  ;;  %v482_v42 = vsel %vm381_vm2, %v4092_v41, %v481_v16 }
 0x10d   : > { %v466_v1 = vrot.slane %v456_v12, 4  ;;  %v379_v20 = vrot.slane %v369_v23, 4  ;;  %1947 = vmatprep.subr.bf16.mxu0 %v3318_v34  ;;  %v3333_v15 = vcombine.low %v396_v14, %v482_v42  ;;  %v3334_v18 = vcombine.high %v396_v14, %v482_v42  ;;  %1830 = vmatprep.mubr.bf16.mxu1 %v3538_v6 }
 0x10f   : > { %v483_v43 = vsel %vm292_vm0, %v465_v59, %v466_v1  ;;  %v397_v35 = vsel %vm292_vm0, %v378_v58, %v379_v20  ;;  %3410 = vmatmul.mubr.msk.bf16.vlgmr.msra.gmra.mrb[24].mxu0 %vm1461_vm7, %v3840_v57  ;;  %1896 = vmatprep.subr.bf16.mxu1 %v3334_v18 }
 0x110   : > { %v627_v10 = vpop.permute.xlu1 %626  ;;  %v540_v49 = vpop.permute.xlu0 %539  ;;  %1897 = vmatpush1.bf16.msra.mxu1 %v3333_v15  ;;  %1948 = vmatpush1.bf16.msra.mxu0 %v3317_v26  ;;  %v398_v41 = vsel %vm381_vm2, %v367_v0, %v397_v35  ;;  %v484_v25 = vsel %vm381_vm2, %v454_v63, %v483_v43 }
 0x111   : > { %v638_v3 = vrot.slane %v627_v10, 4  ;;  %v551_v32 = vrot.slane %v540_v49, 4  ;;  %v3335_v30 = vcombine.low %v398_v41, %v484_v25  ;;  %v3336_v19 = vcombine.high %v398_v41, %v484_v25  ;;  %1883 = vmatprep.mubr.bf16.mxu0 %v3538_v6 }
 0x113   : > { %v655_v44 = vsel %vm292_vm0, %v637_v22, %v638_v3  ;;  %v568_v46 = vsel %vm292_vm0, %v550_v38, %v551_v32  ;;  %3408 = vmatmul.mubr.msk.bf16.gmra.mrb[20].mxu1 %vm1461_vm7, %v3881_v29  ;;  %1949 = vmatprep.subr.bf16.mxu0 %v3336_v19 }
 0x114   : > { %v629_v40 = vpop.permute.xlu1 %628  ;;  %v542_v54 = vpop.permute.xlu0 %541  ;;  %1950 = vmatpush1.bf16.msra.mxu0 %v3335_v30  ;;  %v569_v31 = vsel %vm554_vm3, %v4125_v21, %v568_v46  ;;  %v656_v39 = vsel %vm641_vm4, %v4123_v7, %v655_v44  ;;  %1926 = vmatprep.mubr.bf16.mxu1 %v3538_v6 }
 0x115   : > { %v639_v22 = vrot.slane %v629_v40, 4  ;;  %v552_v45 = vrot.slane %v542_v54, 4  ;;  %v3351_v47 = vcombine.low %v569_v31, %v656_v39  ;;  %v3352_v50 = vcombine.high %v569_v31, %v656_v39 }
 0x117   : > { %v657_v38 = vsel %vm292_vm0, %v638_v3, %v639_v22  ;;  %v570_v5 = vsel %vm292_vm0, %v551_v32, %v552_v45  ;;  %3411 = vmatmul.mubr.msk.bf16.gmra.mrb[28].mxu0 %vm1461_vm7, %v3881_v29  ;;  %1898 = vmatprep.subr.bf16.mxu1 %v3352_v50 }
 0x118   : > { %v800_v51 = vpop.permute.xlu1 %799  ;;  %v714_v2 = vpop.permute.xlu0 %713  ;;  %1899 = vmatpush1.bf16.msra.mxu1 %v3351_v47  ;;  %v571_v21 = vsel %vm554_vm3, %v540_v49, %v570_v5  ;;  %v658_v7 = vsel %vm641_vm4, %v627_v10, %v657_v38  ;;  %1979 = vmatprep.mubr.bf16.mxu0 %v3538_v6 }
 0x119   : > { %v811_v13 = vrot.slane %v800_v51, 4  ;;  %v725_v61 = vrot.slane %v714_v2, 4  ;;  %v3353_v62 = vcombine.low %v571_v21, %v658_v7  ;;  %v3354_v24 = vcombine.high %v571_v21, %v658_v7 }
 0x11b   : > { %v828_v33 = vsel %vm292_vm0, %v810_v37, %v811_v13  ;;  %v741_v55 = vsel %vm292_vm0, %v724_v48, %v725_v61  ;;  %1951 = vmatprep.subr.bf16.mxu0 %v3354_v24  ;;  %v4292_v24 = vld [vmem:[%s4508_s3] sm:$0xff] }
 0x11c   : > { %v802_v4 = vpop.permute.xlu1 %801  ;;  %v716_v63 = vpop.permute.xlu0 %715  ;;  %1952 = vmatpush1.bf16.msra.mxu0 %v3353_v62  ;;  %v742_v0 = vsel %vm641_vm4, %v4153_v36, %v741_v55  ;;  %v829_v27 = vsel %vm814_vm5, %v4151_v28, %v828_v33 }
 0x11d   : > { %v812_v60 = vrot.slane %v802_v4, 4  ;;  %v726_v59 = vrot.slane %v716_v63, 4  ;;  %v3369_v58 = vcombine.low %v742_v0, %v829_v27  ;;  %v3370_v9 = vcombine.high %v742_v0, %v829_v27 }
 0x11f   : > { %v830_v37 = vsel %vm292_vm0, %v811_v13, %v812_v60  ;;  %v743_v56 = vsel %vm292_vm0, %v725_v61, %v726_v59  ;;  %1900 = vmatprep.subr.bf16.mxu1 %v3370_v9 }
 0x120   : > { %v889_v48 = vpop.permute.xlu1 %888  ;;  %v887_v8 = vpop.permute.xlu0 %886  ;;  %1901 = vmatpush1.bf16.msra.mxu1 %v3369_v58  ;;  %v744_v16 = vsel %vm641_vm4, %v714_v2, %v743_v56  ;;  %v831_v17 = vsel %vm814_vm5, %v800_v51, %v830_v37 }
 0x121   : > { %v899_v36 = vrot.slane %v889_v48, 4  ;;  %v898_v11 = vrot.slane %v887_v8, 4  ;;  %v3371_v34 = vcombine.low %v744_v16, %v831_v17  ;;  %v3372_v28 = vcombine.high %v744_v16, %v831_v17 }
 0x123   : > { %v915_v12 = vsel %vm292_vm0, %v897_v52, %v898_v11  ;;  %v917_v23 = vsel %vm292_vm0, %v898_v11, %v899_v36  ;;  %1953 = vmatprep.subr.bf16.mxu0 %v3372_v28 }
 0x124   : > { %v918_v14 = vsel %vm901_vm6, %v887_v8, %v917_v23  ;;  %1954 = vmatpush1.bf16.msra.mxu0 %v3371_v34  ;;  %v916_v42 = vsel %vm901_vm6, %v4175_v53, %v915_v12  ;;  %v3539_v53 = vmov 0.0  }
 0x125   : > { %v3389_v1 = vcombine.low %v918_v14, %v918_v14  ;;  %v3390_v20 = vcombine.high %v918_v14, %v918_v14  ;;  %v3388_v15 = vcombine.high %v916_v42, %v916_v42  ;;  %v3387_v18 = vcombine.low %v916_v42, %v916_v42 }
 0x127   : > { %3412 = vmatprep.subr.msk.bf16.mxu1 %vm292_vm0, %v3388_v15  ;;  %3415 = vmatprep.subr.msk.bf16.mxu0 %vm292_vm0, %v3390_v20  ;;  %v1512_v26 = vsel %vm292_vm0, %v3387_v18, 0  ;;  %v1518_v52 = vsel %vm292_vm0, %v3389_v1, 0 }
 0x128   : > { %1903 = vmatpush1.bf16.msra.mxu1 %v1512_v26  ;;  %1956 = vmatpush1.bf16.msra.mxu0 %v1518_v52 }
 0x12b   : > { %3413 = vmatmul.mubr.msk.bf16.vlgmr.msra.gmra.mrb[24].mxu1 %vm1461_vm7, %v3840_v57  ;;  %3416 = vmatmul.mubr.msk.bf16.vlgmr.msra.gmra.mrb[32].mxu0 %vm1461_vm7, %v3840_v57 }
 0x12c   : > { %1936 = vmatprep.mubr.bf16.mxu1 %v3538_v6  ;;  %1989 = vmatprep.mubr.bf16.mxu0 %v3538_v6 }
 0x131   : > { %v4273_v43 = vpop.permute.xlu0 %1028  ;;  %v4275_v10 = vpop.permute.xlu1 %1033 }
 0x133   : > { %3414 = vmatmul.mubr.msk.bf16.gmra.mrb[28].mxu1 %vm1461_vm7, %v3881_v29  ;;  %3417 = vmatmul.mubr.msk.bf16.gmra.mrb[36].mxu0 %vm1461_vm7, %v3881_v29 }
 0x134   : > { %2147 = vmatprep.mubr.f32.mxu1 %v3539_v53  ;;  %2360 = vmatprep.mubr.f32.mxu0 %v3539_v53 }
 0x135   : > { %v4281_v46 = vpop.permute.xlu1 %1038  ;;  %v4283_v39 = vpop.permute.xlu0 %1043 }
 0x182   : > { %v1557_v35 = vpop.f32.mrb[0].mxu0 }
 0x183   : > { %v1559_v57 = vpop.f32.mrb[1].mxu0  ;;  %v1558_v49 = vadd.f32 %v1557_v35, %v4273_v43 }
 0x184   : > { %v1561_v6 = vpop.f32.mrb[2].mxu0  ;;  %v1560_v41 = vadd.f32 %v1559_v57, %v4273_v43 }
 0x185   : > { %v1563_v25 = vpop.f32.mrb[3].mxu0  ;;  %v1562_v3 = vadd.f32 %v1561_v6, %v4275_v10  ;;  %v2000_v29 = vmax.f32 %v1558_v49, 0.0 }
 0x186   : > { %v1564_v32 = vadd.f32 %v1563_v25, %v4275_v10  ;;  %v2001_v30 = vmax.f32 %v1560_v41, 0.0 }
 0x187   : > { %v2018_v19 = vmax.f32 %v1562_v3, 0.0 }
 0x188   : > { %v2019_v44 = vmax.f32 %v1564_v32, 0.0 }
 0x189   : > { %v3431_v40 = vpack.c.bf16 %v2018_v19, %v2000_v29 }
 0x18a   : > { %v3429_v54 = vpack.c.bf16 %v2019_v44, %v2001_v30  ;;  %v1567_v31 = vpop.f32.mrb[4].mxu0 }
 0x18b   : > { %v1569_v22 = vpop.f32.mrb[5].mxu0  ;;  %v1568_v45 = vadd.f32 %v1567_v31, %v4281_v46 }
 0x18c   : > { %v1571_v47 = vpop.f32.mrb[6].mxu0  ;;  %v1570_v50 = vadd.f32 %v1569_v22, %v4281_v46  ;;  %3430 = vmatprep.subr.bf16.mxu1 %v3429_v54 }
 0x18d   : > { %v1573_v38 = vpop.f32.mrb[7].mxu0  ;;  %3432 = vmatpush1.bf16.msra.mxu1 %v3431_v40  ;;  %v1572_v5 = vadd.f32 %v1571_v47, %v4283_v39  ;;  %v2036_v51 = vmax.f32 %v1568_v45, 0.0 }
 0x18e   : > { %v1574_v2 = vadd.f32 %v1573_v38, %v4283_v39  ;;  %v2037_v21 = vmax.f32 %v1570_v50, 0.0 }
 0x18f   : > { %v2054_v7 = vmax.f32 %v1572_v5, 0.0 }
 0x190   : > { %v2055_v13 = vmax.f32 %v1574_v2, 0.0 }
 0x191   : > { %v3435_v61 = vpack.c.bf16 %v2054_v7, %v2036_v51 }
 0x192   : > { %v3433_v62 = vpack.c.bf16 %v2055_v13, %v2037_v21 }
 0x194   : > { %3434 = vmatprep.subr.bf16.mxu1 %v3433_v62 }
 0x195   : > { %3436 = vmatpush1.bf16.msra.mxu1 %v3435_v61 }
 0x198   : > { %3418 = vmatmul.mubr.msk.f32.vlgmr.msra.gmra.mrb[32].mxu1 %vm2079_vm8, %v4292_v24 }
 0x199   : > { %2218 = vmatprep.mubr.f32.mxu1 %v3539_v53 }
 0x19e   : > { %v1610_v33 = vpop.f32.mrb[0].mxu1 }
 0x19f   : > { %v1611_v55 = vadd.f32 %v1610_v33, %v4273_v43  ;;  %v1612_v4 = vpop.f32.mrb[1].mxu1 }
 0x1a0   : > { %v1613_v63 = vadd.f32 %v1612_v4, %v4273_v43  ;;  %v1614_v0 = vpop.f32.mrb[2].mxu1 }
 0x1a1   : > { %v2002_v27 = vmax.f32 %v1611_v55, 0.0  ;;  %v1615_v60 = vadd.f32 %v1614_v0, %v4275_v10  ;;  %v1616_v59 = vpop.f32.mrb[3].mxu1 }
 0x1a2   : > { %v2003_v58 = vmax.f32 %v1613_v63, 0.0  ;;  %v1617_v9 = vadd.f32 %v1616_v59, %v4275_v10  ;;  %v1663_v37 = vpop.f32.mrb[8].mxu0 }
 0x1a3   : > { %v2020_v56 = vmax.f32 %v1615_v60, 0.0  ;;  %v1664_v48 = vadd.f32 %v1663_v37, %v4273_v43  ;;  %v1665_v8 = vpop.f32.mrb[9].mxu0 }
 0x1a4   : > { %v2021_v16 = vmax.f32 %v1617_v9, 0.0  ;;  %v1666_v17 = vadd.f32 %v1665_v8, %v4273_v43  ;;  %v1667_v36 = vpop.f32.mrb[10].mxu0 }
 0x1a5   : > { %v3439_v11 = vpack.c.bf16 %v2020_v56, %v2002_v27  ;;  %v2004_v34 = vmax.f32 %v1664_v48, 0.0  ;;  %v1668_v28 = vadd.f32 %v1667_v36, %v4275_v10  ;;  %v1669_v12 = vpop.f32.mrb[11].mxu0 }
 0x1a6   : > { %v3437_v23 = vpack.c.bf16 %v2021_v16, %v2003_v58  ;;  %v1620_v14 = vpop.f32.mrb[4].mxu1  ;;  %v2005_v42 = vmax.f32 %v1666_v17, 0.0  ;;  %v1670_v1 = vadd.f32 %v1669_v12, %v4275_v10 }
 0x1a7   : > { %v1621_v20 = vadd.f32 %v1620_v14, %v4281_v46  ;;  %v1622_v15 = vpop.f32.mrb[5].mxu1  ;;  %v2022_v18 = vmax.f32 %v1668_v28, 0.0 }
 0x1a8   : > { %v1623_v26 = vadd.f32 %v1622_v15, %v4281_v46  ;;  %v1624_v52 = vpop.f32.mrb[6].mxu1  ;;  %3438 = vmatprep.subr.bf16.mxu1 %v3437_v23  ;;  %v2023_v35 = vmax.f32 %v1670_v1, 0.0 }
 0x1a9   : > { %v2038_v57 = vmax.f32 %v1621_v20, 0.0  ;;  %v1625_v49 = vadd.f32 %v1624_v52, %v4283_v39  ;;  %v1626_v6 = vpop.f32.mrb[7].mxu1  ;;  %v3447_v41 = vpack.c.bf16 %v2022_v18, %v2004_v34  ;;  %3440 = vmatpush1.bf16.msra.mxu1 %v3439_v11 }
 0x1aa   : > { %v2039_v25 = vmax.f32 %v1623_v26, 0.0  ;;  %v1627_v3 = vadd.f32 %v1626_v6, %v4283_v39  ;;  %v3445_v29 = vpack.c.bf16 %v2023_v35, %v2005_v42  ;;  %v1673_v32 = vpop.f32.mrb[12].mxu0 }
 0x1ab   : > { %v2056_v30 = vmax.f32 %v1625_v49, 0.0  ;;  %v1674_v19 = vadd.f32 %v1673_v32, %v4281_v46  ;;  %v1675_v44 = vpop.f32.mrb[13].mxu0 }
 0x1ac   : > { %v2057_v40 = vmax.f32 %v1627_v3, 0.0  ;;  %v1676_v54 = vadd.f32 %v1675_v44, %v4281_v46  ;;  %v1677_v31 = vpop.f32.mrb[14].mxu0 }
 0x1ad   : > { %v3443_v22 = vpack.c.bf16 %v2056_v30, %v2038_v57  ;;  %v2040_v45 = vmax.f32 %v1674_v19, 0.0  ;;  %v1678_v47 = vadd.f32 %v1677_v31, %v4283_v39  ;;  %v1679_v50 = vpop.f32.mrb[15].mxu0 }
 0x1ae   : > { %v3441_v38 = vpack.c.bf16 %v2057_v40, %v2039_v25  ;;  %v2041_v5 = vmax.f32 %v1676_v54, 0.0  ;;  %v1680_v51 = vadd.f32 %v1679_v50, %v4283_v39 }
 0x1af   : > { %v2058_v2 = vmax.f32 %v1678_v47, 0.0 }
 0x1b0   : > { %3442 = vmatprep.subr.bf16.mxu1 %v3441_v38  ;;  %v2059_v21 = vmax.f32 %v1680_v51, 0.0 }
 0x1b1   : > { %v3451_v7 = vpack.c.bf16 %v2058_v2, %v2040_v45  ;;  %3444 = vmatpush1.bf16.msra.mxu1 %v3443_v22 }
 0x1b2   : > { %v3449_v13 = vpack.c.bf16 %v2059_v21, %v2041_v5  ;;  %3446 = vmatprep.subr.bf16.mxu1 %v3445_v29 }
 0x1b4   : > { %3419 = vmatmul.mubr.msk.f32.vlgmr.msra.gmra.mrb[34].mxu1 %vm2079_vm8, %v4292_v24 }
 0x1b5   : > { %3448 = vmatpush1.bf16.msra.mxu1 %v3447_v41  ;;  %2289 = vmatprep.mubr.f32.mxu1 %v3539_v53 }
 0x1b6   : > { %3450 = vmatprep.subr.bf16.mxu1 %v3449_v13 }
 0x1b9   : > { %3452 = vmatpush1.bf16.msra.mxu1 %v3451_v7 }
 0x1bc   : > { %3420 = vmatmul.mubr.msk.f32.vlgmr.msra.gmra.mrb[36].mxu1 %vm2079_vm8, %v4292_v24 }
 0x1bd   : > { %2431 = vmatprep.mubr.f32.mxu1 %v3539_v53 }
 0x1be   : > { %v1716_v61 = vpop.f32.mrb[8].mxu1 }
 0x1bf   : > { %v1717_v62 = vadd.f32 %v1716_v61, %v4273_v43  ;;  %v1718_v33 = vpop.f32.mrb[9].mxu1 }
 0x1c0   : > { %v1719_v55 = vadd.f32 %v1718_v33, %v4273_v43  ;;  %v1720_v4 = vpop.f32.mrb[10].mxu1 }
 0x1c1   : > { %v2006_v63 = vmax.f32 %v1717_v62, 0.0  ;;  %v1721_v0 = vadd.f32 %v1720_v4, %v4275_v10  ;;  %v1722_v27 = vpop.f32.mrb[11].mxu1 }
 0x1c2   : > { %v2007_v60 = vmax.f32 %v1719_v55, 0.0  ;;  %v1723_v59 = vadd.f32 %v1722_v27, %v4275_v10  ;;  %v1769_v58 = vpop.f32.mrb[16].mxu0 }
 0x1c3   : > { %v2024_v9 = vmax.f32 %v1721_v0, 0.0  ;;  %v1770_v37 = vadd.f32 %v1769_v58, %v4273_v43  ;;  %v1771_v56 = vpop.f32.mrb[17].mxu0 }
 0x1c4   : > { %v2025_v48 = vmax.f32 %v1723_v59, 0.0  ;;  %v1772_v8 = vadd.f32 %v1771_v56, %v4273_v43  ;;  %v1773_v16 = vpop.f32.mrb[18].mxu0 }
 0x1c5   : > { %v3455_v17 = vpack.c.bf16 %v2024_v9, %v2006_v63  ;;  %v2008_v36 = vmax.f32 %v1770_v37, 0.0  ;;  %v1774_v11 = vadd.f32 %v1773_v16, %v4275_v10  ;;  %v1775_v34 = vpop.f32.mrb[19].mxu0 }
 0x1c6   : > { %v3453_v28 = vpack.c.bf16 %v2025_v48, %v2007_v60  ;;  %v1726_v12 = vpop.f32.mrb[12].mxu1  ;;  %v2009_v23 = vmax.f32 %v1772_v8, 0.0  ;;  %v1776_v14 = vadd.f32 %v1775_v34, %v4275_v10 }
 0x1c7   : > { %v1727_v42 = vadd.f32 %v1726_v12, %v4281_v46  ;;  %v1728_v1 = vpop.f32.mrb[13].mxu1  ;;  %v2026_v20 = vmax.f32 %v1774_v11, 0.0 }
 0x1c8   : > { %v1729_v15 = vadd.f32 %v1728_v1, %v4281_v46  ;;  %v1730_v18 = vpop.f32.mrb[14].mxu1  ;;  %v2027_v26 = vmax.f32 %v1776_v14, 0.0  ;;  %3454 = vmatprep.subr.bf16.mxu0 %v3453_v28 }
 0x1c9   : > { %v2042_v52 = vmax.f32 %v1727_v42, 0.0  ;;  %v1731_v35 = vadd.f32 %v1730_v18, %v4283_v39  ;;  %v3463_v57 = vpack.c.bf16 %v2026_v20, %v2008_v36  ;;  %v1732_v49 = vpop.f32.mrb[15].mxu1  ;;  %3456 = vmatpush1.bf16.msra.mxu0 %v3455_v17 }
 0x1ca   : > { %v2043_v6 = vmax.f32 %v1729_v15, 0.0  ;;  %v1733_v41 = vadd.f32 %v1732_v49, %v4283_v39  ;;  %v3461_v25 = vpack.c.bf16 %v2027_v26, %v2009_v23  ;;  %v1779_v3 = vpop.f32.mrb[20].mxu0 }
 0x1cb   : > { %v2060_v29 = vmax.f32 %v1731_v35, 0.0  ;;  %v1780_v32 = vadd.f32 %v1779_v3, %v4281_v46  ;;  %v1781_v30 = vpop.f32.mrb[21].mxu0 }
 0x1cc   : > { %v2061_v19 = vmax.f32 %v1733_v41, 0.0  ;;  %v1782_v44 = vadd.f32 %v1781_v30, %v4281_v46  ;;  %v1783_v40 = vpop.f32.mrb[22].mxu0  ;;  %3462 = vmatprep.subr.bf16.mxu1 %v3461_v25 }
 0x1cd   : > { %v3459_v54 = vpack.c.bf16 %v2060_v29, %v2042_v52  ;;  %v2044_v31 = vmax.f32 %v1780_v32, 0.0  ;;  %v1784_v22 = vadd.f32 %v1783_v40, %v4283_v39  ;;  %v1785_v45 = vpop.f32.mrb[23].mxu0  ;;  %3464 = vmatpush1.bf16.msra.mxu1 %v3463_v57 }
 0x1ce   : > { %v3457_v47 = vpack.c.bf16 %v2061_v19, %v2043_v6  ;;  %v2045_v50 = vmax.f32 %v1782_v44, 0.0  ;;  %v1786_v38 = vadd.f32 %v1785_v45, %v4283_v39 }
 0x1cf   : > { %v2062_v5 = vmax.f32 %v1784_v22, 0.0 }
 0x1d0   : > { %v2063_v51 = vmax.f32 %v1786_v38, 0.0  ;;  %3458 = vmatprep.subr.bf16.mxu0 %v3457_v47 }
 0x1d1   : > { %v3467_v2 = vpack.c.bf16 %v2062_v5, %v2044_v31  ;;  %3460 = vmatpush1.bf16.msra.mxu0 %v3459_v54 }
 0x1d2   : > { %v3465_v21 = vpack.c.bf16 %v2063_v51, %v2045_v50 }
 0x1d4   : > { %3421 = vmatmul.mubr.msk.f32.vlgmr.msra.gmra.mrb[40].mxu0 %vm2079_vm8, %v4292_v24  ;;  %3466 = vmatprep.subr.bf16.mxu1 %v3465_v21 }
 0x1d5   : > { %3468 = vmatpush1.bf16.msra.mxu1 %v3467_v2  ;;  %2502 = vmatprep.mubr.f32.mxu0 %v3539_v53 }
 0x1d8   : > { %3422 = vmatmul.mubr.msk.f32.vlgmr.msra.gmra.mrb[38].mxu1 %vm2079_vm8, %v4292_v24 }
 0x1d9   : > { %2573 = vmatprep.mubr.f32.mxu1 %v3539_v53 }
 0x1de   : > { %v1822_v7 = vpop.f32.mrb[16].mxu1 }
 0x1df   : > { %v1823_v13 = vadd.f32 %v1822_v7, %v4273_v43  ;;  %v1824_v61 = vpop.f32.mrb[17].mxu1 }
 0x1e0   : > { %v1825_v62 = vadd.f32 %v1824_v61, %v4273_v43  ;;  %v1826_v33 = vpop.f32.mrb[18].mxu1 }
 0x1e1   : > { %v2010_v55 = vmax.f32 %v1823_v13, 0.0  ;;  %v1827_v4 = vadd.f32 %v1826_v33, %v4275_v10  ;;  %v1828_v63 = vpop.f32.mrb[19].mxu1 }
 0x1e2   : > { %v2011_v0 = vmax.f32 %v1825_v62, 0.0  ;;  %v1829_v27 = vadd.f32 %v1828_v63, %v4275_v10  ;;  %v1875_v60 = vpop.f32.mrb[24].mxu0 }
 0x1e3   : > { %v2028_v59 = vmax.f32 %v1827_v4, 0.0  ;;  %v1876_v58 = vadd.f32 %v1875_v60, %v4273_v43  ;;  %v1877_v9 = vpop.f32.mrb[25].mxu0 }
 0x1e4   : > { %v2029_v37 = vmax.f32 %v1829_v27, 0.0  ;;  %v1878_v56 = vadd.f32 %v1877_v9, %v4273_v43  ;;  %v1879_v48 = vpop.f32.mrb[26].mxu0 }
 0x1e5   : > { %v3471_v8 = vpack.c.bf16 %v2028_v59, %v2010_v55  ;;  %v1880_v16 = vadd.f32 %v1879_v48, %v4275_v10  ;;  %v1881_v17 = vpop.f32.mrb[27].mxu0  ;;  %v2012_v28 = vmax.f32 %v1876_v58, 0.0 }
 0x1e6   : > { %v3469_v36 = vpack.c.bf16 %v2029_v37, %v2011_v0  ;;  %v1882_v11 = vadd.f32 %v1881_v17, %v4275_v10  ;;  %v1832_v34 = vpop.f32.mrb[20].mxu1  ;;  %v2013_v42 = vmax.f32 %v1878_v56, 0.0 }
 0x1e7   : > { %v2030_v12 = vmax.f32 %v1880_v16, 0.0  ;;  %v1833_v23 = vadd.f32 %v1832_v34, %v4281_v46  ;;  %v1834_v14 = vpop.f32.mrb[21].mxu1 }
 0x1e8   : > { %v2031_v1 = vmax.f32 %v1882_v11, 0.0  ;;  %v1835_v20 = vadd.f32 %v1834_v14, %v4281_v46  ;;  %v1836_v15 = vpop.f32.mrb[22].mxu1  ;;  %3470 = vmatprep.subr.bf16.mxu0 %v3469_v36 }
 0x1e9   : > { %v3479_v18 = vpack.c.bf16 %v2030_v12, %v2012_v28  ;;  %v1837_v26 = vadd.f32 %v1836_v15, %v4283_v39  ;;  %v1838_v52 = vpop.f32.mrb[23].mxu1  ;;  %3472 = vmatpush1.bf16.msra.mxu0 %v3471_v8  ;;  %v2046_v6 = vmax.f32 %v1833_v23, 0.0 }
 0x1ea   : > { %v3477_v35 = vpack.c.bf16 %v2031_v1, %v2013_v42  ;;  %v1839_v57 = vadd.f32 %v1838_v52, %v4283_v39  ;;  %v1885_v49 = vpop.f32.mrb[28].mxu0  ;;  %v2047_v29 = vmax.f32 %v1835_v20, 0.0 }
 0x1eb   : > { %v2064_v41 = vmax.f32 %v1837_v26, 0.0  ;;  %v1886_v25 = vadd.f32 %v1885_v49, %v4281_v46  ;;  %v1887_v3 = vpop.f32.mrb[29].mxu0 }
 0x1ec   : > { %v2065_v32 = vmax.f32 %v1839_v57, 0.0  ;;  %v1888_v30 = vadd.f32 %v1887_v3, %v4281_v46  ;;  %v1889_v19 = vpop.f32.mrb[30].mxu0  ;;  %3478 = vmatprep.subr.bf16.mxu1 %v3477_v35 }
 0x1ed   : > { %v3475_v44 = vpack.c.bf16 %v2064_v41, %v2046_v6  ;;  %v1890_v40 = vadd.f32 %v1889_v19, %v4283_v39  ;;  %v1891_v54 = vpop.f32.mrb[31].mxu0  ;;  %3480 = vmatpush1.bf16.msra.mxu1 %v3479_v18  ;;  %v2048_v45 = vmax.f32 %v1886_v25, 0.0 }
 0x1ee   : > { %v3473_v31 = vpack.c.bf16 %v2065_v32, %v2047_v29  ;;  %v1892_v22 = vadd.f32 %v1891_v54, %v4283_v39  ;;  %v2049_v50 = vmax.f32 %v1888_v30, 0.0 }
 0x1ef   : > { %v2066_v47 = vmax.f32 %v1890_v40, 0.0 }
 0x1f0   : > { %v2067_v38 = vmax.f32 %v1892_v22, 0.0  ;;  %3474 = vmatprep.subr.bf16.mxu0 %v3473_v31 }
 0x1f1   : > { %v3483_v5 = vpack.c.bf16 %v2066_v47, %v2048_v45  ;;  %3476 = vmatpush1.bf16.msra.mxu0 %v3475_v44 }
 0x1f2   : > { %v3481_v51 = vpack.c.bf16 %v2067_v38, %v2049_v50 }
 0x1f4   : > { %3423 = vmatmul.mubr.msk.f32.vlgmr.msra.gmra.mrb[42].mxu0 %vm2079_vm8, %v4292_v24  ;;  %3482 = vmatprep.subr.bf16.mxu1 %v3481_v51 }
 0x1f5   : > { %3484 = vmatpush1.bf16.msra.mxu1 %v3483_v5  ;;  %2644 = vmatprep.mubr.f32.mxu0 %v3539_v53 }
 0x1f8   : > { %3424 = vmatmul.mubr.msk.f32.vlgmr.msra.gmra.mrb[40].mxu1 %vm2079_vm8, %v4292_v24 }
 0x1f9   : > { %2715 = vmatprep.mubr.f32.mxu1 %v3539_v53 }
 0x1fe   : > { %v1928_v2 = vpop.f32.mrb[24].mxu1  ;;  %v1981_v21 = vpop.f32.mrb[32].mxu0 }
 0x1ff   : > { %v1929_v7 = vadd.f32 %v1928_v2, %v4273_v43  ;;  %v1982_v13 = vadd.f32 %v1981_v21, %v4273_v43  ;;  %v1930_v61 = vpop.f32.mrb[25].mxu1  ;;  %v1983_v62 = vpop.f32.mrb[33].mxu0 }
 0x200   : > { %v1931_v33 = vadd.f32 %v1930_v61, %v4273_v43  ;;  %v1984_v55 = vadd.f32 %v1983_v62, %v4273_v43  ;;  %v1932_v4 = vpop.f32.mrb[26].mxu1  ;;  %v1985_v63 = vpop.f32.mrb[34].mxu0 }
 0x201   : > { %v1933_v0 = vadd.f32 %v1932_v4, %v4275_v10  ;;  %v1986_v27 = vadd.f32 %v1985_v63, %v4275_v10  ;;  %v1934_v60 = vpop.f32.mrb[27].mxu1  ;;  %v1987_v53 = vpop.f32.mrb[35].mxu0  ;;  %v2014_v9 = vmax.f32 %v1929_v7, 0.0  ;;  %v2016_v37 = vmax.f32 %v1982_v13, 0.0 }
 0x202   : > { %v1935_v59 = vadd.f32 %v1934_v60, %v4275_v10  ;;  %v1988_v58 = vadd.f32 %v1987_v53, %v4275_v10  ;;  %v2015_v8 = vmax.f32 %v1931_v33, 0.0  ;;  %v2017_v16 = vmax.f32 %v1984_v55, 0.0 }
 0x203   : > { %v2032_v56 = vmax.f32 %v1933_v0, 0.0  ;;  %v2034_v48 = vmax.f32 %v1986_v27, 0.0  ;;  %v2830_v13 = vlaneseq }
 0x204   : > { %v2033_v17 = vmax.f32 %v1935_v59, 0.0  ;;  %v2035_v43 = vmax.f32 %v1988_v58, 0.0 }
 0x205   : > { %v3487_v36 = vpack.c.bf16 %v2032_v56, %v2014_v9  ;;  %v3495_v11 = vpack.c.bf16 %v2034_v48, %v2016_v37 }
 0x206   : > { %v3485_v34 = vpack.c.bf16 %v2033_v17, %v2015_v8  ;;  %v3493_v28 = vpack.c.bf16 %v2035_v43, %v2017_v16  ;;  %v1938_v12 = vpop.f32.mrb[28].mxu1  ;;  %v1991_v23 = vpop.f32.mrb[36].mxu0 }
 0x207   : > { %v1939_v14 = vadd.f32 %v1938_v12, %v4281_v46  ;;  %v1992_v42 = vadd.f32 %v1991_v23, %v4281_v46  ;;  %v1940_v1 = vpop.f32.mrb[29].mxu1  ;;  %v1993_v10 = vpop.f32.mrb[37].mxu0 }
 0x208   : > { %v1941_v20 = vadd.f32 %v1940_v1, %v4281_v46  ;;  %v1994_v15 = vadd.f32 %v1993_v10, %v4281_v46  ;;  %v1942_v18 = vpop.f32.mrb[30].mxu1  ;;  %v1995_v26 = vpop.f32.mrb[38].mxu0  ;;  %3486 = vmatprep.subr.bf16.mxu0 %v3485_v34  ;;  %3494 = vmatprep.subr.bf16.mxu1 %v3493_v28 }
 0x209   : > { %v1943_v52 = vadd.f32 %v1942_v18, %v4283_v39  ;;  %v1996_v35 = vadd.f32 %v1995_v26, %v4283_v39  ;;  %v1944_v57 = vpop.f32.mrb[31].mxu1  ;;  %v1997_v49 = vpop.f32.mrb[39].mxu0  ;;  %3488 = vmatpush1.bf16.msra.mxu0 %v3487_v36  ;;  %3496 = vmatpush1.bf16.msra.mxu1 %v3495_v11  ;;  %v2050_v25 = vmax.f32 %v1939_v14, 0.0  ;;  %v2052_v3 = vmax.f32 %v1992_v42, 0.0 }
 0x20a   : > { %v1945_v6 = vadd.f32 %v1944_v57, %v4283_v39  ;;  %v1998_v41 = vadd.f32 %v1997_v49, %v4283_v39  ;;  %v2051_v32 = vmax.f32 %v1941_v20, 0.0  ;;  %v2053_v30 = vmax.f32 %v1994_v15, 0.0  ;;  %v4383_v39 = vpop.permute.xlu1 %2076 }
 0x20b   : > { %v2068_v29 = vmax.f32 %v1943_v52, 0.0  ;;  %v2070_v46 = vmax.f32 %v1996_v35, 0.0 }
 0x20c   : > { %v2069_v19 = vmax.f32 %v1945_v6, 0.0  ;;  %v2071_v44 = vmax.f32 %v1998_v41, 0.0 }
 0x20d   : > { %v3491_v40 = vpack.c.bf16 %v2068_v29, %v2050_v25  ;;  %v3499_v54 = vpack.c.bf16 %v2070_v46, %v2052_v3 }
 0x20e   : > { %v3489_v31 = vpack.c.bf16 %v2069_v19, %v2051_v32  ;;  %v3497_v22 = vpack.c.bf16 %v2071_v44, %v2053_v30 }
 0x210   : > { %3490 = vmatprep.subr.bf16.mxu0 %v3489_v31  ;;  %3498 = vmatprep.subr.bf16.mxu1 %v3497_v22 }
 0x211   : > { %3492 = vmatpush1.bf16.msra.mxu0 %v3491_v40  ;;  %3500 = vmatpush1.bf16.msra.mxu1 %v3499_v54 }
 0x214   : > { %3425 = vmatmul.mubr.msk.f32.vlgmr.msra.gmra.mrb[44].mxu0 %vm2079_vm8, %v4292_v24  ;;  %3426 = vmatmul.mubr.msk.f32.vlgmr.msra.gmra.mrb[42].mxu1 %vm2079_vm8, %v4292_v24  ;;  %v4388_v24 = vshrl.u32 %v2830_v13, 7 }
 0x26b   : > { %v2149_v45 = vpop.f32.mrb[32].mxu1 }
 0x26c   : > { %v2150_v47 = vadd.f32 %v2149_v45, %v4383_v39  ;;  %v2151_v50 = vpop.f32.mrb[33].mxu1 }
 0x26d   : > { %v2152_v38 = vadd.f32 %v2151_v50, %v4383_v39 }
 0x26e   : > { %v2722_v5 = vrot.slane %v2150_v47, 4 }
 0x26f   : > { %v2728_v51 = vrot.slane %v2152_v38, 4 }
 0x270   : > { %v2723_v2 = vmax.f32 %v2150_v47, %v2722_v5 }
 0x271   : > { %v2729_v21 = vmax.f32 %v2152_v38, %v2728_v51 }
 0x272   : > { %v2724_v7 = vrot.slane %v2723_v2, 2 }
 0x273   : > { %v2730_v61 = vrot.slane %v2729_v21, 2 }
 0x274   : > { %v2725_v62 = vmax.f32 %v2723_v2, %v2724_v7 }
 0x275   : > { %v2731_v33 = vmax.f32 %v2729_v21, %v2730_v61 }
 0x276   : > { %v2726_v55 = vrot.slane %v2725_v62, 1 }
 0x277   : > { %v2732_v4 = vrot.slane %v2731_v33, 1 }
 0x278   : > { %v2727_v63 = vmax.f32 %v2725_v62, %v2726_v55 }
 0x279   : > { %v2733_v0 = vmax.f32 %v2731_v33, %v2732_v4 }
 0x27a   : > { %vm2832_vm9 = vcmp.eq.f32.partialorder %v2150_v47, %v2727_v63 }
 0x27b   : > { %v2850_v27 = vsel %vm2832_vm9, %v4388_v24, 8  ;;  %vm2833_vm10 = vcmp.eq.f32.partialorder %v2152_v38, %v2733_v0 }
 0x27c   : > { %v2868_v60 = vrot.slane %v2850_v27, 4  ;;  %v2851_v53 = vsel %vm2833_vm10, %v4388_v24, 8 }
 0x27d   : > { %v2877_v59 = vrot.slane %v2851_v53, 4 }
 0x27e   : > { %vm2869_vm11 = vcmp.lt.s32.totalorder %v2850_v27, %v2868_v60 }
 0x27f   : > { %v2870_v58 = vsel %vm2869_vm11, %v2850_v27, %v2868_v60  ;;  %vm2878_vm12 = vcmp.lt.s32.totalorder %v2851_v53, %v2877_v59  ;;  %v3540_v27 = vmov 1966171168  }
 0x280   : > { %v2871_v9 = vrot.slane %v2870_v58, 2  ;;  %v2879_v37 = vsel %vm2878_vm12, %v2851_v53, %v2877_v59  ;;  %v3125_v60 = vunpack.c.l.s4 %v3540_v27 }
 0x281   : > { %v2880_v56 = vrot.slane %v2879_v37, 2 }
 0x282   : > { %vm2872_vm13 = vcmp.lt.s32.totalorder %v2870_v58, %v2871_v9 }
 0x283   : > { %v2873_v48 = vsel %vm2872_vm13, %v2870_v58, %v2871_v9  ;;  %vm2881_vm14 = vcmp.lt.s32.totalorder %v2879_v37, %v2880_v56 }
 0x284   : > { %v2874_v8 = vrot.slane %v2873_v48, 1  ;;  %v2882_v16 = vsel %vm2881_vm14, %v2879_v37, %v2880_v56 }
 0x285   : > { %v2883_v17 = vrot.slane %v2882_v16, 1 }
 0x286   : > { %vm2875_vm15 = vcmp.lt.s32.totalorder %v2873_v48, %v2874_v8 }
 0x287   : > { %v2876_v43 = vsel %vm2875_vm15, %v2873_v48, %v2874_v8  ;;  %vm2884_vm0 = vcmp.lt.s32.totalorder %v2882_v16, %v2883_v17  ;;  %v2220_v36 = vpop.f32.mrb[34].mxu1 }
 0x288   : > { %v3030_v11 = vmul.u32 100, %v2876_v43  ;;  %v2885_v34 = vsel %vm2884_vm0, %v2882_v16, %v2883_v17  ;;  %v2221_v28 = vadd.f32 %v2220_v36, %v4383_v39  ;;  %v2222_v12 = vpop.f32.mrb[35].mxu1  ;;  %v3126_v16 = vunpack.c.0.s8 %v3125_v60 }
 0x289   : > { %v3031_v23 = vmul.u32 100, %v2885_v34  ;;  %v2223_v14 = vadd.f32 %v2222_v12, %v4383_v39 }
 0x28a   : > { %vm3048_vm1 = vcmp.gt.s32.totalorder %v3030_v11, 0  ;;  %v2734_v42 = vrot.slane %v2221_v28, 4 }
 0x28b   : > { %v3049_v1 = vsel %vm3048_vm1, %v3030_v11, 0  ;;  %vm3050_vm2 = vcmp.gt.s32.totalorder %v3031_v23, 0  ;;  %v2740_v10 = vrot.slane %v2223_v14, 4 }
 0x28c   : > { %vm3084_vm3 = vcmp.lt.s32.totalorder %v3049_v1, 255  ;;  %v3051_v20 = vsel %vm3050_vm2, %v3031_v23, 0  ;;  %v2735_v15 = vmax.f32 %v2221_v28, %v2734_v42 }
 0x28d   : > { %v4394_v18 = vsel %vm3084_vm3, %v3049_v1, 255  ;;  %vm3086_vm4 = vcmp.lt.s32.totalorder %v3051_v20, 255  ;;  %v2741_v26 = vmax.f32 %v2223_v14, %v2740_v10 }
 0x28e   : > { %v4396_v52 = vsel %vm3086_vm4, %v3051_v20, 255  ;;  %v2736_v35 = vrot.slane %v2735_v15, 2 }
 0x28f   : > { %v3120_v57 = vcombine.low %v4394_v18, %v4396_v52  ;;  %v2742_v49 = vrot.slane %v2741_v26, 2  ;;  %v2291_v6 = vpop.f32.mrb[36].mxu1 }
 0x290   : > { %v2737_v41 = vmax.f32 %v2735_v15, %v2736_v35  ;;  %v2292_v25 = vadd.f32 %v2291_v6, %v4383_v39  ;;  %v2293_v3 = vpop.f32.mrb[37].mxu1 }
 0x291   : > { %v2743_v29 = vmax.f32 %v2741_v26, %v2742_v49  ;;  %v2294_v46 = vadd.f32 %v2293_v3, %v4383_v39 }
 0x292   : > { %v2738_v32 = vrot.slane %v2737_v41, 1  ;;  %v2746_v30 = vrot.slane %v2292_v25, 4 }
 0x293   : > { %v2744_v19 = vrot.slane %v2743_v29, 1  ;;  %v2752_v44 = vrot.slane %v2294_v46, 4 }
 0x294   : > { %v2739_v40 = vmax.f32 %v2737_v41, %v2738_v32  ;;  %v2747_v54 = vmax.f32 %v2292_v25, %v2746_v30 }
 0x295   : > { %v2745_v31 = vmax.f32 %v2743_v29, %v2744_v19  ;;  %v2753_v22 = vmax.f32 %v2294_v46, %v2752_v44 }
 0x296   : > { %vm2834_vm5 = vcmp.eq.f32.partialorder %v2221_v28, %v2739_v40  ;;  %v2748_v45 = vrot.slane %v2747_v54, 2 }
 0x297   : > { %v2852_v47 = vsel %vm2834_vm5, %v4388_v24, 8  ;;  %vm2835_vm6 = vcmp.eq.f32.partialorder %v2223_v14, %v2745_v31  ;;  %v2754_v50 = vrot.slane %v2753_v22, 2  ;;  %v4407_v14 = vsub.s32 %v3126_v16, %v4388_v24 }
 0x298   : > { %v2886_v38 = vrot.slane %v2852_v47, 4  ;;  %v2853_v5 = vsel %vm2835_vm6, %v4388_v24, 8  ;;  %v2749_v51 = vmax.f32 %v2747_v54, %v2748_v45 }
 0x299   : > { %v2895_v2 = vrot.slane %v2853_v5, 4  ;;  %v2755_v21 = vmax.f32 %v2753_v22, %v2754_v50  ;;  %v4416_v22 = vrot.slane %v3120_v57, %v4407_v14 }
 0x29a   : > { %vm2887_vm7 = vcmp.lt.s32.totalorder %v2852_v47, %v2886_v38  ;;  %v2750_v7 = vrot.slane %v2749_v51, 1 }
 0x29b   : > { %v2888_v61 = vsel %vm2887_vm7, %v2852_v47, %v2886_v38  ;;  %vm2896_vm8 = vcmp.lt.s32.totalorder %v2853_v5, %v2895_v2  ;;  %v2756_v62 = vrot.slane %v2755_v21, 1 }
 0x29c   : > { %v2889_v33 = vrot.slane %v2888_v61, 2  ;;  %v2897_v55 = vsel %vm2896_vm8, %v2853_v5, %v2895_v2  ;;  %v2751_v4 = vmax.f32 %v2749_v51, %v2750_v7 }
 0x29d   : > { %v2898_v63 = vrot.slane %v2897_v55, 2  ;;  %v2757_v0 = vmax.f32 %v2755_v21, %v2756_v62 }
 0x29e   : > { %vm2890_vm9 = vcmp.lt.s32.totalorder %v2888_v61, %v2889_v33  ;;  %vm2836_vm10 = vcmp.eq.f32.partialorder %v2292_v25, %v2751_v4 }
 0x29f   : > { %v2891_v53 = vsel %vm2890_vm9, %v2888_v61, %v2889_v33  ;;  %vm2899_vm11 = vcmp.lt.s32.totalorder %v2897_v55, %v2898_v63  ;;  %v2854_v59 = vsel %vm2836_vm10, %v4388_v24, 8  ;;  %vm2837_vm12 = vcmp.eq.f32.partialorder %v2294_v46, %v2757_v0 }
 0x2a0   : > { %v2892_v58 = vrot.slane %v2891_v53, 1  ;;  %v2900_v9 = vsel %vm2899_vm11, %v2897_v55, %v2898_v63  ;;  %v2904_v37 = vrot.slane %v2854_v59, 4  ;;  %v2855_v56 = vsel %vm2837_vm12, %v4388_v24, 8 }
 0x2a1   : > { %v2901_v48 = vrot.slane %v2900_v9, 1  ;;  %v2913_v8 = vrot.slane %v2855_v56, 4 }
 0x2a2   : > { %vm2893_vm13 = vcmp.lt.s32.totalorder %v2891_v53, %v2892_v58  ;;  %vm2905_vm14 = vcmp.lt.s32.totalorder %v2854_v59, %v2904_v37 }
 0x2a3   : > { %v2894_v17 = vsel %vm2893_vm13, %v2891_v53, %v2892_v58  ;;  %vm2902_vm15 = vcmp.lt.s32.totalorder %v2900_v9, %v2901_v48  ;;  %v2906_v43 = vsel %vm2905_vm14, %v2854_v59, %v2904_v37  ;;  %vm2914_vm0 = vcmp.lt.s32.totalorder %v2855_v56, %v2913_v8 }
 0x2a4   : > { %v3032_v36 = vmul.u32 100, %v2894_v17  ;;  %v2903_v11 = vsel %vm2902_vm15, %v2900_v9, %v2901_v48  ;;  %v2907_v34 = vrot.slane %v2906_v43, 2  ;;  %v2915_v28 = vsel %vm2914_vm0, %v2855_v56, %v2913_v8 }
 0x2a5   : > { %v3033_v12 = vmul.u32 100, %v2903_v11  ;;  %v2916_v23 = vrot.slane %v2915_v28, 2 }
 0x2a6   : > { %vm3052_vm1 = vcmp.gt.s32.totalorder %v3032_v36, 0  ;;  %vm2908_vm2 = vcmp.lt.s32.totalorder %v2906_v43, %v2907_v34 }
 0x2a7   : > { %v3053_v42 = vsel %vm3052_vm1, %v3032_v36, 0  ;;  %vm3054_vm3 = vcmp.gt.s32.totalorder %v3033_v12, 0  ;;  %v2909_v1 = vsel %vm2908_vm2, %v2906_v43, %v2907_v34  ;;  %vm2917_vm4 = vcmp.lt.s32.totalorder %v2915_v28, %v2916_v23  ;;  %v2362_v10 = vpop.f32.mrb[40].mxu0 }
 0x2a8   : > { %vm3088_vm5 = vcmp.lt.s32.totalorder %v3053_v42, 255  ;;  %v3055_v20 = vsel %vm3054_vm3, %v3033_v12, 0  ;;  %v2910_v15 = vrot.slane %v2909_v1, 1  ;;  %v2918_v26 = vsel %vm2917_vm4, %v2915_v28, %v2916_v23  ;;  %v2364_v35 = vpop.f32.mrb[41].mxu0 }
 0x2a9   : > { %v3089_v49 = vsel %vm3088_vm5, %v3053_v42, 255  ;;  %vm3090_vm6 = vcmp.lt.s32.totalorder %v3055_v20, 255  ;;  %v2919_v6 = vrot.slane %v2918_v26, 1  ;;  %v2363_v41 = vadd.f32 %v2362_v10, %v4383_v39 }
 0x2aa   : > { %v3091_v25 = vsel %vm3090_vm6, %v3055_v20, 255  ;;  %vm2911_vm7 = vcmp.lt.s32.totalorder %v2909_v1, %v2910_v15  ;;  %v2365_v3 = vadd.f32 %v2364_v35, %v4383_v39 }
 0x2ab   : > { %v3121_v29 = vcombine.low %v3089_v49, %v3091_v25  ;;  %v2912_v46 = vsel %vm2911_vm7, %v2909_v1, %v2910_v15  ;;  %vm2920_vm8 = vcmp.lt.s32.totalorder %v2918_v26, %v2919_v6  ;;  %v2758_v32 = vrot.slane %v2363_v41, 4  ;;  %v2433_v30 = vpop.f32.mrb[38].mxu1 }
 0x2ac   : > { %v3034_v19 = vmul.u32 100, %v2912_v46  ;;  %v2921_v44 = vsel %vm2920_vm8, %v2918_v26, %v2919_v6  ;;  %v2764_v40 = vrot.slane %v2365_v3, 4  ;;  %v2434_v54 = vadd.f32 %v2433_v30, %v4383_v39  ;;  %v2435_v31 = vpop.f32.mrb[39].mxu1 }
 0x2ad   : > { %v4419_v45 = vrot.slane %v3121_v29, %v4407_v14  ;;  %v3035_v47 = vmul.u32 100, %v2921_v44  ;;  %v2759_v50 = vmax.f32 %v2363_v41, %v2758_v32  ;;  %v2436_v51 = vadd.f32 %v2435_v31, %v4383_v39 }
 0x2ae   : > { %vm3056_vm9 = vcmp.gt.s32.totalorder %v3034_v19, 0  ;;  %v2765_v38 = vmax.f32 %v2365_v3, %v2764_v40  ;;  %v2770_v5 = vrot.slane %v2434_v54, 4 }
 0x2af   : > { %v3152_v2 = vcombine.low %v4416_v22, %v4419_v45  ;;  %v3057_v21 = vsel %vm3056_vm9, %v3034_v19, 0  ;;  %vm3058_vm10 = vcmp.gt.s32.totalorder %v3035_v47, 0  ;;  %v2760_v7 = vrot.slane %v2759_v50, 2 }
 0x2b0   : > { %vm3092_vm11 = vcmp.lt.s32.totalorder %v3057_v21, 255  ;;  %v3059_v18 = vsel %vm3058_vm10, %v3035_v47, 0  ;;  %v2766_v52 = vrot.slane %v2765_v38, 2  ;;  %v2771_v57 = vmax.f32 %v2434_v54, %v2770_v5 }
 0x2b1   : > { %v4424_v61 = vsel %vm3092_vm11, %v3057_v21, 255  ;;  %vm3094_vm12 = vcmp.lt.s32.totalorder %v3059_v18, 255  ;;  %v2761_v62 = vmax.f32 %v2759_v50, %v2760_v7  ;;  %v2776_v63 = vrot.slane %v2436_v51, 4 }
 0x2b2   : > { %v4426_v33 = vsel %vm3094_vm12, %v3059_v18, 255  ;;  %v2767_v55 = vmax.f32 %v2765_v38, %v2766_v52  ;;  %v2772_v4 = vrot.slane %v2771_v57, 2 }
 0x2b3   : > { %v3122_v0 = vcombine.low %v4424_v61, %v4426_v33  ;;  %v2762_v27 = vrot.slane %v2761_v62, 1  ;;  %v2777_v59 = vmax.f32 %v2436_v51, %v2776_v63 }
 0x2b4   : > { %v2768_v60 = vrot.slane %v2767_v55, 1  ;;  %v2773_v53 = vmax.f32 %v2771_v57, %v2772_v4 }
 0x2b5   : > { %v2763_v58 = vmax.f32 %v2761_v62, %v2762_v27  ;;  %v2778_v56 = vrot.slane %v2777_v59, 2 }
 0x2b6   : > { %v2769_v9 = vmax.f32 %v2767_v55, %v2768_v60  ;;  %v2774_v37 = vrot.slane %v2773_v53, 1 }
 0x2b7   : > { %vm2838_vm13 = vcmp.eq.f32.partialorder %v2363_v41, %v2763_v58  ;;  %v2779_v16 = vmax.f32 %v2777_v59, %v2778_v56  ;;  %v3144_v58 = vrot.slane %v3122_v0, %v4407_v14 }
 0x2b8   : > { %v2856_v48 = vsel %vm2838_vm13, %v4388_v24, 8  ;;  %vm2839_vm14 = vcmp.eq.f32.partialorder %v2365_v3, %v2769_v9  ;;  %v2775_v8 = vmax.f32 %v2773_v53, %v2774_v37 }
 0x2b9   : > { %v2922_v17 = vrot.slane %v2856_v48, 4  ;;  %v2857_v43 = vsel %vm2839_vm14, %v4388_v24, 8  ;;  %v2780_v11 = vrot.slane %v2779_v16, 1 }
 0x2ba   : > { %v2931_v36 = vrot.slane %v2857_v43, 4  ;;  %vm2840_vm15 = vcmp.eq.f32.partialorder %v2434_v54, %v2775_v8 }
 0x2bb   : > { %vm2923_vm0 = vcmp.lt.s32.totalorder %v2856_v48, %v2922_v17  ;;  %v2858_v34 = vsel %vm2840_vm15, %v4388_v24, 8  ;;  %v2781_v23 = vmax.f32 %v2779_v16, %v2780_v11 }
 0x2bc   : > { %v2924_v28 = vsel %vm2923_vm0, %v2856_v48, %v2922_v17  ;;  %vm2932_vm1 = vcmp.lt.s32.totalorder %v2857_v43, %v2931_v36  ;;  %v2940_v12 = vrot.slane %v2858_v34, 4 }
 0x2bd   : > { %v2925_v42 = vrot.slane %v2924_v28, 2  ;;  %v2933_v1 = vsel %vm2932_vm1, %v2857_v43, %v2931_v36  ;;  %vm2841_vm3 = vcmp.eq.f32.partialorder %v2436_v51, %v2781_v23  ;;  %v3160_v23 = vrot.slane %v3152_v2, %v4407_v14 }
 0x2be   : > { %v2934_v10 = vrot.slane %v2933_v1, 2  ;;  %vm2941_vm2 = vcmp.lt.s32.totalorder %v2858_v34, %v2940_v12  ;;  %v2859_v15 = vsel %vm2841_vm3, %v4388_v24, 8 }
 0x2bf   : > { %vm2926_vm4 = vcmp.lt.s32.totalorder %v2924_v28, %v2925_v42  ;;  %v2942_v20 = vsel %vm2941_vm2, %v2858_v34, %v2940_v12  ;;  %v2949_v49 = vrot.slane %v2859_v15, 4 }
 0x2c0   : > { %v2927_v26 = vsel %vm2926_vm4, %v2924_v28, %v2925_v42  ;;  %vm2935_vm5 = vcmp.lt.s32.totalorder %v2933_v1, %v2934_v10  ;;  %v2943_v35 = vrot.slane %v2942_v20, 2 }
 0x2c1   : > { %v2928_v6 = vrot.slane %v2927_v26, 1  ;;  %v2936_v41 = vsel %vm2935_vm5, %v2933_v1, %v2934_v10  ;;  %vm2950_vm7 = vcmp.lt.s32.totalorder %v2859_v15, %v2949_v49 }
 0x2c2   : > { %v2937_v25 = vrot.slane %v2936_v41, 1  ;;  %vm2944_vm6 = vcmp.lt.s32.totalorder %v2942_v20, %v2943_v35  ;;  %v2951_v29 = vsel %vm2950_vm7, %v2859_v15, %v2949_v49 }
 0x2c3   : > { %vm2929_vm8 = vcmp.lt.s32.totalorder %v2927_v26, %v2928_v6  ;;  %v2945_v3 = vsel %vm2944_vm6, %v2942_v20, %v2943_v35  ;;  %v2952_v30 = vrot.slane %v2951_v29, 2 }
 0x2c4   : > { %v2930_v46 = vsel %vm2929_vm8, %v2927_v26, %v2928_v6  ;;  %vm2938_vm9 = vcmp.lt.s32.totalorder %v2936_v41, %v2937_v25  ;;  %v2946_v32 = vrot.slane %v2945_v3, 1 }
 0x2c5   : > { %v3036_v19 = vmul.u32 100, %v2930_v46  ;;  %v2939_v44 = vsel %vm2938_vm9, %v2936_v41, %v2937_v25  ;;  %vm2953_vm11 = vcmp.lt.s32.totalorder %v2951_v29, %v2952_v30 }
 0x2c6   : > { %v3037_v40 = vmul.u32 100, %v2939_v44  ;;  %vm2947_vm10 = vcmp.lt.s32.totalorder %v2945_v3, %v2946_v32  ;;  %v2954_v31 = vsel %vm2953_vm11, %v2951_v29, %v2952_v30 }
 0x2c7   : > { %vm3060_vm12 = vcmp.gt.s32.totalorder %v3036_v19, 0  ;;  %v2948_v54 = vsel %vm2947_vm10, %v2945_v3, %v2946_v32  ;;  %v2504_v47 = vpop.f32.mrb[42].mxu0  ;;  %v2955_v5 = vrot.slane %v2954_v31, 1 }
 0x2c8   : > { %v3061_v50 = vsel %vm3060_vm12, %v3036_v19, 0  ;;  %vm3062_vm13 = vcmp.gt.s32.totalorder %v3037_v40, 0  ;;  %v3038_v38 = vmul.u32 100, %v2948_v54  ;;  %v2506_v51 = vpop.f32.mrb[43].mxu0  ;;  %v2505_v7 = vadd.f32 %v2504_v47, %v4383_v39 }
 0x2c9   : > { %vm3096_vm14 = vcmp.lt.s32.totalorder %v3061_v50, 255  ;;  %v3063_v21 = vsel %vm3062_vm13, %v3037_v40, 0  ;;  %v2507_v18 = vadd.f32 %v2506_v51, %v4383_v39  ;;  %vm2956_vm1 = vcmp.lt.s32.totalorder %v2954_v31, %v2955_v5 }
 0x2ca   : > { %v3097_v52 = vsel %vm3096_vm14, %v3061_v50, 255  ;;  %vm3098_vm15 = vcmp.lt.s32.totalorder %v3063_v21, 255  ;;  %vm3064_vm0 = vcmp.gt.s32.totalorder %v3038_v38, 0  ;;  %v2957_v55 = vsel %vm2956_vm1, %v2954_v31, %v2955_v5 }
 0x2cb   : > { %v3099_v57 = vsel %vm3098_vm15, %v3063_v21, 255  ;;  %v3065_v62 = vsel %vm3064_vm0, %v3038_v38, 0  ;;  %v2782_v4 = vrot.slane %v2505_v7, 4  ;;  %v2575_v63 = vpop.f32.mrb[40].mxu1  ;;  %v3039_v60 = vmul.u32 100, %v2957_v55 }
 0x2cc   : > { %v3123_v27 = vcombine.low %v3097_v52, %v3099_v57  ;;  %vm3100_vm2 = vcmp.lt.s32.totalorder %v3065_v62, 255  ;;  %v2788_v53 = vrot.slane %v2507_v18, 4  ;;  %v2577_v59 = vpop.f32.mrb[41].mxu1  ;;  %v2576_v37 = vadd.f32 %v2575_v63, %v4383_v39 }
 0x2cd   : > { %v2783_v9 = vmax.f32 %v2505_v7, %v2782_v4  ;;  %v2578_v56 = vadd.f32 %v2577_v59, %v4383_v39  ;;  %v4443_v8 = vsel %vm3100_vm2, %v3065_v62, 255  ;;  %vm3066_vm3 = vcmp.gt.s32.totalorder %v3039_v60, 0 }
 0x2ce   : > { %v3151_v48 = vrot.slane %v3123_v27, %v4407_v14  ;;  %v2789_v16 = vmax.f32 %v2507_v18, %v2788_v53  ;;  %v3067_v17 = vsel %vm3066_vm3, %v3039_v60, 0  ;;  %v2794_v36 = vrot.slane %v2576_v37, 4 }
 0x2cf   : > { %v2784_v43 = vrot.slane %v2783_v9, 2  ;;  %v2800_v11 = vrot.slane %v2578_v56, 4  ;;  %vm3102_vm4 = vcmp.lt.s32.totalorder %v3067_v17, 255 }
 0x2d0   : > { %v3153_v34 = vcombine.low %v3144_v58, %v3151_v48  ;;  %v2790_v61 = vrot.slane %v2789_v16, 2  ;;  %v4446_v33 = vsel %vm3102_vm4, %v3067_v17, 255  ;;  %v2795_v28 = vmax.f32 %v2576_v37, %v2794_v36 }
 0x2d1   : > { %v2785_v0 = vmax.f32 %v2783_v9, %v2784_v43  ;;  %v2801_v12 = vmax.f32 %v2578_v56, %v2800_v11  ;;  %v3169_v1 = vcombine.low %v4443_v8, %v4446_v33 }
 0x2d2   : > { %v3167_v42 = vrot.slane %v3153_v34, %v4407_v14  ;;  %v2791_v10 = vmax.f32 %v2789_v16, %v2790_v61  ;;  %v2796_v15 = vrot.slane %v2795_v28, 2 }
 0x2d3   : > { %v2786_v20 = vrot.slane %v2785_v0, 1  ;;  %v2802_v26 = vrot.slane %v2801_v12, 2 }
 0x2d4   : > { %v3168_v35 = vcombine.low %v3160_v23, %v3167_v42  ;;  %v2792_v49 = vrot.slane %v2791_v10, 1  ;;  %v2797_v22 = vmax.f32 %v2795_v28, %v2796_v15 }
 0x2d5   : > { %v2787_v6 = vmax.f32 %v2785_v0, %v2786_v20  ;;  %v2803_v45 = vmax.f32 %v2801_v12, %v2802_v26 }
 0x2d6   : > { %3233 = vst [vmem:[%s4458_s25] sm:$0xff] %v3168_v35  ;;  %v2793_v2 = vmax.f32 %v2791_v10, %v2792_v49  ;;  %v2798_v41 = vrot.slane %v2797_v22, 1 }
 0x2d7   : > { %vm2842_vm5 = vcmp.eq.f32.partialorder %v2505_v7, %v2787_v6  ;;  %v2804_v25 = vrot.slane %v2803_v45, 1 }
 0x2d8   : > { %v2860_v3 = vsel %vm2842_vm5, %v4388_v24, 8  ;;  %vm2843_vm6 = vcmp.eq.f32.partialorder %v2507_v18, %v2793_v2  ;;  %v2799_v32 = vmax.f32 %v2797_v22, %v2798_v41 }
 0x2d9   : > { %v2958_v29 = vrot.slane %v2860_v3, 4  ;;  %v2861_v46 = vsel %vm2843_vm6, %v4388_v24, 8  ;;  %v2805_v30 = vmax.f32 %v2803_v45, %v2804_v25 }
 0x2da   : > { %v2967_v19 = vrot.slane %v2861_v46, 4  ;;  %vm2844_vm8 = vcmp.eq.f32.partialorder %v2576_v37, %v2799_v32  ;;  %v4466_v37 = vrot.slane %v3169_v1, %v4407_v14 }
 0x2db   : > { %vm2959_vm7 = vcmp.lt.s32.totalorder %v2860_v3, %v2958_v29  ;;  %vm2845_vm9 = vcmp.eq.f32.partialorder %v2578_v56, %v2805_v30  ;;  %v2862_v40 = vsel %vm2844_vm8, %v4388_v24, 8 }
 0x2dc   : > { %v2960_v44 = vsel %vm2959_vm7, %v2860_v3, %v2958_v29  ;;  %vm2968_vm10 = vcmp.lt.s32.totalorder %v2861_v46, %v2967_v19  ;;  %v2863_v54 = vsel %vm2845_vm9, %v4388_v24, 8  ;;  %v2976_v50 = vrot.slane %v2862_v40, 4 }
 0x2dd   : > { %v2961_v31 = vrot.slane %v2960_v44, 2  ;;  %v2969_v47 = vsel %vm2968_vm10, %v2861_v46, %v2967_v19  ;;  %v2985_v38 = vrot.slane %v2863_v54, 4 }
 0x2de   : > { %v2970_v5 = vrot.slane %v2969_v47, 2  ;;  %vm2977_vm12 = vcmp.lt.s32.totalorder %v2862_v40, %v2976_v50 }
 0x2df   : > { %vm2962_vm11 = vcmp.lt.s32.totalorder %v2960_v44, %v2961_v31  ;;  %vm2986_vm13 = vcmp.lt.s32.totalorder %v2863_v54, %v2985_v38  ;;  %v2978_v21 = vsel %vm2977_vm12, %v2862_v40, %v2976_v50 }
 0x2e0   : > { %v2963_v51 = vsel %vm2962_vm11, %v2960_v44, %v2961_v31  ;;  %vm2971_vm14 = vcmp.lt.s32.totalorder %v2969_v47, %v2970_v5  ;;  %v2987_v7 = vsel %vm2986_vm13, %v2863_v54, %v2985_v38  ;;  %v2979_v57 = vrot.slane %v2978_v21, 2 }
 0x2e1   : > { %v2964_v18 = vrot.slane %v2963_v51, 1  ;;  %v2972_v52 = vsel %vm2971_vm14, %v2969_v47, %v2970_v5  ;;  %v2988_v62 = vrot.slane %v2987_v7, 2 }
 0x2e2   : > { %v2973_v55 = vrot.slane %v2972_v52, 1  ;;  %vm2980_vm0 = vcmp.lt.s32.totalorder %v2978_v21, %v2979_v57 }
 0x2e3   : > { %vm2965_vm15 = vcmp.lt.s32.totalorder %v2963_v51, %v2964_v18  ;;  %vm2989_vm1 = vcmp.lt.s32.totalorder %v2987_v7, %v2988_v62  ;;  %v2981_v63 = vsel %vm2980_vm0, %v2978_v21, %v2979_v57 }
 0x2e4   : > { %v2966_v4 = vsel %vm2965_vm15, %v2963_v51, %v2964_v18  ;;  %vm2974_vm2 = vcmp.lt.s32.totalorder %v2972_v52, %v2973_v55  ;;  %v2990_v27 = vsel %vm2989_vm1, %v2987_v7, %v2988_v62  ;;  %v2982_v59 = vrot.slane %v2981_v63, 1 }
 0x2e5   : > { %v3040_v60 = vmul.u32 100, %v2966_v4  ;;  %v2975_v53 = vsel %vm2974_vm2, %v2972_v52, %v2973_v55  ;;  %v2991_v58 = vrot.slane %v2990_v27, 1 }
 0x2e6   : > { %v3041_v9 = vmul.u32 100, %v2975_v53  ;;  %vm2983_vm4 = vcmp.lt.s32.totalorder %v2981_v63, %v2982_v59 }
 0x2e7   : > { %vm3068_vm3 = vcmp.gt.s32.totalorder %v3040_v60, 0  ;;  %vm2992_vm5 = vcmp.lt.s32.totalorder %v2990_v27, %v2991_v58  ;;  %v2646_v56 = vpop.f32.mrb[44].mxu0  ;;  %v2717_v48 = vpop.f32.mrb[42].mxu1  ;;  %v2984_v16 = vsel %vm2983_vm4, %v2981_v63, %v2982_v59 }
 0x2e8   : > { %v3069_v8 = vsel %vm3068_vm3, %v3040_v60, 0  ;;  %vm3070_vm6 = vcmp.gt.s32.totalorder %v3041_v9, 0  ;;  %v2993_v17 = vsel %vm2992_vm5, %v2990_v27, %v2991_v58  ;;  %v2648_v43 = vpop.f32.mrb[45].mxu0  ;;  %v2719_v36 = vpop.f32.mrb[43].mxu1  ;;  %v3042_v34 = vmul.u32 100, %v2984_v16 }
 0x2e9   : > { %vm3104_vm7 = vcmp.lt.s32.totalorder %v3069_v8, 255  ;;  %v3071_v11 = vsel %vm3070_vm6, %v3041_v9, 0  ;;  %v3043_v61 = vmul.u32 100, %v2993_v17  ;;  %v2647_v0 = vadd.f32 %v2646_v56, %v4383_v39 }
 0x2ea   : > { %v3105_v33 = vsel %vm3104_vm7, %v3069_v8, 255  ;;  %vm3106_vm8 = vcmp.lt.s32.totalorder %v3071_v11, 255  ;;  %v2718_v28 = vadd.f32 %v2717_v48, %v4383_v39  ;;  %vm3072_vm9 = vcmp.gt.s32.totalorder %v3042_v34, 0 }
 0x2eb   : > { %v3107_v12 = vsel %vm3106_vm8, %v3071_v11, 255  ;;  %vm3074_vm10 = vcmp.gt.s32.totalorder %v3043_v61, 0  ;;  %v2649_v23 = vadd.f32 %v2648_v43, %v4383_v39  ;;  %v3073_v1 = vsel %vm3072_vm9, %v3042_v34, 0 }
 0x2ec   : > { %v3170_v42 = vcombine.low %v3105_v33, %v3107_v12  ;;  %v3075_v10 = vsel %vm3074_vm10, %v3043_v61, 0  ;;  %v2806_v20 = vrot.slane %v2647_v0, 4  ;;  %vm3108_vm11 = vcmp.lt.s32.totalorder %v3073_v1, 255 }
 0x2ed   : > { %vm3110_vm12 = vcmp.lt.s32.totalorder %v3075_v10, 255  ;;  %v2818_v15 = vrot.slane %v2718_v28, 4  ;;  %v2812_v26 = vrot.slane %v2649_v23, 4  ;;  %v4474_v49 = vsel %vm3108_vm11, %v3073_v1, 255 }
 0x2ee   : > { %v4472_v35 = vrot.slane %v3170_v42, %v4407_v14  ;;  %v4476_v6 = vsel %vm3110_vm12, %v3075_v10, 255  ;;  %v2807_v22 = vmax.f32 %v2647_v0, %v2806_v20  ;;  %v2720_v25 = vadd.f32 %v2719_v36, %v4383_v39 }
 0x2ef   : > { %v3171_v45 = vcombine.low %v4474_v49, %v4476_v6  ;;  %v2819_v2 = vmax.f32 %v2718_v28, %v2818_v15  ;;  %v2813_v41 = vmax.f32 %v2649_v23, %v2812_v26 }
 0x2f0   : > { %v3201_v3 = vcombine.low %v4466_v37, %v4472_v35  ;;  %v2808_v29 = vrot.slane %v2807_v22, 2  ;;  %v2824_v30 = vrot.slane %v2720_v25, 4 }
 0x2f1   : > { %v2820_v46 = vrot.slane %v2819_v2, 2  ;;  %v2814_v32 = vrot.slane %v2813_v41, 2 }
 0x2f2   : > { %v2809_v19 = vmax.f32 %v2807_v22, %v2808_v29  ;;  %v2825_v54 = vmax.f32 %v2720_v25, %v2824_v30 }
 0x2f3   : > { %v2821_v44 = vmax.f32 %v2819_v2, %v2820_v46  ;;  %v2815_v40 = vmax.f32 %v2813_v41, %v2814_v32  ;;  %v3193_v32 = vrot.slane %v3171_v45, %v4407_v14 }
 0x2f4   : > { %v2810_v31 = vrot.slane %v2809_v19, 1  ;;  %v2826_v38 = vrot.slane %v2825_v54, 2 }
 0x2f5   : > { %v2822_v47 = vrot.slane %v2821_v44, 1  ;;  %v2816_v50 = vrot.slane %v2815_v40, 1 }
 0x2f6   : > { %v2811_v5 = vmax.f32 %v2809_v19, %v2810_v31  ;;  %v2827_v7 = vmax.f32 %v2825_v54, %v2826_v38  ;;  %v3209_v54 = vrot.slane %v3201_v3, %v4407_v14 }
 0x2f7   : > { %v2823_v51 = vmax.f32 %v2821_v44, %v2822_v47  ;;  %v2817_v21 = vmax.f32 %v2815_v40, %v2816_v50 }
 0x2f8   : > { %vm2846_vm13 = vcmp.eq.f32.partialorder %v2647_v0, %v2811_v5  ;;  %v2828_v18 = vrot.slane %v2827_v7, 1 }
 0x2f9   : > { %v2864_v39 = vsel %vm2846_vm13, %v4388_v24, 8  ;;  %vm2848_vm14 = vcmp.eq.f32.partialorder %v2718_v28, %v2823_v51  ;;  %vm2847_vm15 = vcmp.eq.f32.partialorder %v2649_v23, %v2817_v21 }
 0x2fa   : > { %v2994_v52 = vrot.slane %v2864_v39, 4  ;;  %v2866_v57 = vsel %vm2848_vm14, %v4388_v24, 8  ;;  %v2865_v62 = vsel %vm2847_vm15, %v4388_v24, 8  ;;  %v2829_v63 = vmax.f32 %v2827_v7, %v2828_v18 }
 0x2fb   : > { %v3012_v55 = vrot.slane %v2866_v57, 4  ;;  %v3003_v4 = vrot.slane %v2865_v62, 4 }
 0x2fc   : > { %vm2995_vm0 = vcmp.lt.s32.totalorder %v2864_v39, %v2994_v52  ;;  %vm2849_vm3 = vcmp.eq.f32.partialorder %v2720_v25, %v2829_v63 }
 0x2fd   : > { %v2996_v27 = vsel %vm2995_vm0, %v2864_v39, %v2994_v52  ;;  %vm3013_vm1 = vcmp.lt.s32.totalorder %v2866_v57, %v3012_v55  ;;  %vm3004_vm2 = vcmp.lt.s32.totalorder %v2865_v62, %v3003_v4  ;;  %v2867_v58 = vsel %vm2849_vm3, %v4388_v24, 8 }
 0x2fe   : > { %v2997_v60 = vrot.slane %v2996_v27, 2  ;;  %v3014_v53 = vsel %vm3013_vm1, %v2866_v57, %v3012_v55  ;;  %v3005_v59 = vsel %vm3004_vm2, %v2865_v62, %v3003_v4  ;;  %v3021_v48 = vrot.slane %v2867_v58, 4 }
 0x2ff   : > { %v3015_v9 = vrot.slane %v3014_v53, 2  ;;  %v3006_v56 = vrot.slane %v3005_v59, 2 }
 0x300   : > { %vm2998_vm4 = vcmp.lt.s32.totalorder %v2996_v27, %v2997_v60  ;;  %vm3022_vm7 = vcmp.lt.s32.totalorder %v2867_v58, %v3021_v48 }
 0x301   : > { %v2999_v8 = vsel %vm2998_vm4, %v2996_v27, %v2997_v60  ;;  %vm3016_vm5 = vcmp.lt.s32.totalorder %v3014_v53, %v3015_v9  ;;  %vm3007_vm6 = vcmp.lt.s32.totalorder %v3005_v59, %v3006_v56  ;;  %v3023_v36 = vsel %vm3022_vm7, %v2867_v58, %v3021_v48 }
 0x302   : > { %v3000_v16 = vrot.slane %v2999_v8, 1  ;;  %v3017_v17 = vsel %vm3016_vm5, %v3014_v53, %v3015_v9  ;;  %v3008_v43 = vsel %vm3007_vm6, %v3005_v59, %v3006_v56  ;;  %v3024_v61 = vrot.slane %v3023_v36, 2 }
 0x303   : > { %v3018_v11 = vrot.slane %v3017_v17, 1  ;;  %v3009_v34 = vrot.slane %v3008_v43, 1  ;;  %vm3237_vm5 = vcmp.lt.s32.totalorder %v2830_v13, 256 }
 0x304   : > { %vm3001_vm8 = vcmp.lt.s32.totalorder %v2999_v8, %v3000_v16  ;;  %vm3025_vm11 = vcmp.lt.s32.totalorder %v3023_v36, %v3024_v61 }
 0x305   : > { %v3002_v33 = vsel %vm3001_vm8, %v2999_v8, %v3000_v16  ;;  %vm3019_vm9 = vcmp.lt.s32.totalorder %v3017_v17, %v3018_v11  ;;  %vm3010_vm10 = vcmp.lt.s32.totalorder %v3008_v43, %v3009_v34  ;;  %v3026_v12 = vsel %vm3025_vm11, %v3023_v36, %v3024_v61 }
 0x306   : > { %v3044_v24 = vmul.u32 100, %v3002_v33  ;;  %v3020_v0 = vsel %vm3019_vm9, %v3017_v17, %v3018_v11  ;;  %v3011_v28 = vsel %vm3010_vm10, %v3008_v43, %v3009_v34  ;;  %v3027_v1 = vrot.slane %v3026_v12, 1 }
 0x307   : > { %v3046_v23 = vmul.u32 100, %v3020_v0  ;;  %v3045_v42 = vmul.u32 100, %v3011_v28 }
 0x308   : > { %vm3076_vm12 = vcmp.gt.s32.totalorder %v3044_v24, 0  ;;  %vm3028_vm15 = vcmp.lt.s32.totalorder %v3026_v12, %v3027_v1 }
 0x309   : > { %v3077_v10 = vsel %vm3076_vm12, %v3044_v24, 0  ;;  %vm3080_vm13 = vcmp.gt.s32.totalorder %v3046_v23, 0  ;;  %vm3078_vm14 = vcmp.gt.s32.totalorder %v3045_v42, 0  ;;  %v3029_v26 = vsel %vm3028_vm15, %v3026_v12, %v3027_v1 }
 0x30a   : > { %vm3112_vm0 = vcmp.lt.s32.totalorder %v3077_v10, 255  ;;  %v3081_v20 = vsel %vm3080_vm13, %v3046_v23, 0  ;;  %v3079_v15 = vsel %vm3078_vm14, %v3045_v42, 0  ;;  %v3047_v2 = vmul.u32 100, %v3029_v26 }
 0x30b   : > { %v3113_v22 = vsel %vm3112_vm0, %v3077_v10, 255  ;;  %vm3116_vm1 = vcmp.lt.s32.totalorder %v3081_v20, 255  ;;  %vm3114_vm2 = vcmp.lt.s32.totalorder %v3079_v15, 255 }
 0x30c   : > { %v3115_v41 = vsel %vm3114_vm2, %v3079_v15, 255  ;;  %vm3082_vm3 = vcmp.gt.s32.totalorder %v3047_v2, 0  ;;  %v3117_v29 = vsel %vm3116_vm1, %v3081_v20, 255 }
 0x30d   : > { %v3172_v25 = vcombine.low %v3113_v22, %v3115_v41  ;;  %v3083_v46 = vsel %vm3082_vm3, %v3047_v2, 0 }
 0x30e   : > { %vm3118_vm4 = vcmp.lt.s32.totalorder %v3083_v46, 255 }
 0x30f   : > { %v3200_v30 = vrot.slane %v3172_v25, %v4407_v14  ;;  %v3119_v19 = vsel %vm3118_vm4, %v3083_v46, 255 }
 0x310   : > { %v3218_v40 = vcombine.low %v3117_v29, %v3119_v19 }
 0x311   : > { %v3202_v44 = vcombine.low %v3193_v32, %v3200_v30 }
 0x312   : > { %v3225_v47 = vrot.slane %v3218_v40, %v4407_v14 }
 0x313   : > { %v3216_v31 = vrot.slane %v3202_v44, %v4407_v14 }
 0x314   : > { %v3232_v49 = vrot.slane %v3225_v47, %v4407_v14 }
 0x315   : > { %v3217_v50 = vcombine.low %v3209_v54, %v3216_v31 }
 0x316   : > { %3239 = vst.msk [vmem:[%s4458_s25 + $0x10] sm:$0x3] %vm3237_vm5, %v3232_v49 }
 0x317   : > { %3234 = vst [vmem:[%s4458_s25 + $0x8] sm:$0xff] %v3217_v50 }
 0x318 PF: > { %s15_s18 = sadd.s32 1, %s3530_s18  }
 0x319   : > { %p12_p4 = scmp.ge.s32.totalorder %s15_s18, 4  }
 0x31b   :  { %14 = sbr.rel (!%p12_p4) target bundleno = 1 (0x1), region = 70 }

</bundles_post_ra>
